<compile_context>
chip_gen: v5e
topology: v5e:2x2
jax: 0.10.0
libtpu: 0.0.40
codegen_flags: <defaults>
</compile_context>

<pallas_src>
import functools
import math

import jax
import jax.numpy as jnp
from jax.experimental import pallas as pl
from jax.experimental.pallas import tpu as pltpu


def _round_up(x, m):
    return (x + m - 1) // m * m


# ----------------------------------------------------------------------------- kernel
def _timotion_kernel(num_heads, e_real,
                     inputs_ref, bias_ref,
                     ln_g_ref, ln_b_ref,
                     wqkv_ref, bqkv_ref,
                     wo_ref, bo_ref,
                     w1_ref, b1_ref,
                     w2_ref, b2_ref,
                     out_ref,
                     attn_sc):
    Bb, L, Ep = inputs_ref.shape
    hd = e_real // num_heads
    scale = 1.0 / math.sqrt(hd)

    xin = inputs_ref[...].reshape(Bb * L, Ep)        # f32, padded lanes are exactly zero
    key_bias = bias_ref[...]                         # (Bb, 1, L) additive 0 / -1e30

    # ---- sa_block LayerNorm over the e_real real features (pad lanes contribute 0) ----
    inv_e = 1.0 / e_real
    mu = jnp.sum(xin, axis=-1, keepdims=True) * inv_e
    ex2 = jnp.sum(xin * xin, axis=-1, keepdims=True) * inv_e
    var = ex2 - mu * mu
    xn = (xin - mu) * jax.lax.rsqrt(var + 1e-5)
    xn = xn * ln_g_ref[...] + ln_b_ref[...]          # padded gamma/beta are 0 -> pad lanes stay 0

    # ---- QKV projection: bf16 operands on the MXU, f32 accumulate ----
    qkv = jnp.dot(xn.astype(jnp.bfloat16), wqkv_ref[...],
                  preferred_element_type=jnp.float32) + bqkv_ref[...]
    q = (qkv[:, :Ep] * scale).astype(jnp.bfloat16).reshape(Bb, L, Ep)   # 128-aligned slices
    k = qkv[:, Ep:2 * Ep].astype(jnp.bfloat16).reshape(Bb, L, Ep)
    v = qkv[:, 2 * Ep:].astype(jnp.bfloat16).reshape(Bb, L, Ep)

    # ---- per-head attention; head outputs written directly into a VMEM scratch slab ----
    attn_sc[...] = jnp.zeros_like(attn_sc)           # also zeroes the padded lanes
    for h in range(num_heads):                       # static unroll over heads
        lo = h * hd
        s = jnp.einsum("bqd,bkd->bqk", q[:, :, lo:lo + hd], k[:, :, lo:lo + hd],
                       preferred_element_type=jnp.float32)              # (Bb, L, L)
        s = s + key_bias                                                 # mask padded keys
        m = jnp.max(s, axis=-1, keepdims=True)
        e = jnp.exp(s - m)
        inv_den = pl.reciprocal(jnp.sum(e, axis=-1, keepdims=True), approx=True)
        p = (e * inv_den).astype(jnp.bfloat16)
        attn_sc[:, :, lo:lo + hd] = jnp.einsum(
            "bqk,bkd->bqd", p, v[:, :, lo:lo + hd],
            preferred_element_type=jnp.float32)

    attn = jnp.dot(attn_sc[...].reshape(Bb * L, Ep).astype(jnp.bfloat16), wo_ref[...],
                   preferred_element_type=jnp.float32) + bo_ref[...]

    h1 = attn + xin                                  # h1 = sa(inputs) + inputs  (f32)

    # ---- FFN: Linear -> exact GELU -> Linear, then residual ----
    ff = jnp.dot(h1.astype(jnp.bfloat16), w1_ref[...],
                 preferred_element_type=jnp.float32) + b1_ref[...]
    # exact erf GELU kept for parity with torch nn.GELU() (tanh-approx would use the EUP slot)
    ff = 0.5 * ff * (1.0 + jax.lax.erf(ff * (2.0 ** -0.5)))
    ff = jnp.dot(ff.astype(jnp.bfloat16), w2_ref[...],
                 preferred_element_type=jnp.float32) + b2_ref[...]

    out_ref[...] = (ff + h1).reshape(Bb, L, Ep)      # out = ffn(h1) + h1


# ----------------------------------------------------------------------------- wrapper
def _pick_block_b(b, max_block=8):
    # fuse batches per grid step, but keep >=2 grid steps when possible (v7x has 2 TCs)
    target = min(max_block, max(1, b // 2))
    bb = target
    while bb > 1 and b % bb:
        bb -= 1
    return max(bb, 1)


def timotion_block_forward(x, y, key_padding_mask, params, num_heads):
    b, t, c = x.shape
    E, L = 2 * c, 2 * t
    F = params["w1"].shape[1]
    Ep, Fp = _round_up(E, 128), _round_up(F, 128)
    Bb = _pick_block_b(b)

    # glue: order-invariant token layout (all even tokens, then all odd tokens) instead of
    # torch's strided interleave; attention is permutation-invariant given a consistently
    # permuted key-padding mask, LN/FFN/residual are per-token, so the math is identical.
    even = jnp.concatenate([x, y], axis=-1)                       # (b, t, E)
    odd = jnp.concatenate([y, x], axis=-1)
    inputs = jnp.concatenate([even, odd], axis=1).astype(jnp.float32)   # (b, L, E)
    inputs = jnp.pad(inputs, ((0, 0), (0, 0), (0, Ep - E)))

    # glue: key-padding bias (True == padded; padding at the sequence tail, as the module's
    # mask construction assumes)
    valid = (~key_padding_mask).sum(-1)                           # (b,)
    pad_half = jnp.arange(t)[None, :] >= valid[:, None]           # (b, t)
    padded = jnp.concatenate([pad_half, pad_half], axis=1)        # (b, L) in permuted order
    mask_bias = jnp.where(padded, -1e30, 0.0).astype(jnp.float32)[:, None, :]   # (b, 1, L)

    # glue: lane-pad all parameters to 128 multiples; matmul weights in bf16, element-wise
    # params (LN gamma/beta, biases) stay f32.
    def pad_mat(w, rows, cols):
        return jnp.pad(w, ((0, rows - w.shape[0]), (0, cols - w.shape[1])))

    wq = params["wqkv"][:, :E]
    wk = params["wqkv"][:, E:2 * E]
    wv = params["wqkv"][:, 2 * E:]
    bq = params["bqkv"][:, :E]
    bk = params["bqkv"][:, E:2 * E]
    bv = params["bqkv"][:, 2 * E:]
    wqkv_p = jnp.concatenate([pad_mat(wq, Ep, Ep), pad_mat(wk, Ep, Ep),
                              pad_mat(wv, Ep, Ep)], axis=1).astype(jnp.bfloat16)
    bqkv_p = jnp.concatenate([pad_mat(bq, 1, Ep), pad_mat(bk, 1, Ep),
                              pad_mat(bv, 1, Ep)], axis=1).astype(jnp.float32)
    wo_p = pad_mat(params["wo"], Ep, Ep).astype(jnp.bfloat16)
    bo_p = pad_mat(params["bo"], 1, Ep).astype(jnp.float32)
    w1_p = pad_mat(params["w1"], Ep, Fp).astype(jnp.bfloat16)
    b1_p = pad_mat(params["b1"], 1, Fp).astype(jnp.float32)
    w2_p = pad_mat(params["w2"], Fp, Ep).astype(jnp.bfloat16)
    b2_p = pad_mat(params["b2"], 1, Ep).astype(jnp.float32)
    ln_g_p = pad_mat(params["ln_g"], 1, Ep).astype(jnp.float32)
    ln_b_p = pad_mat(params["ln_b"], 1, Ep).astype(jnp.float32)

    kernel = functools.partial(_timotion_kernel, num_heads, E)
    full = lambda i: (0, 0)
    per_b3 = lambda i: (i, 0, 0)

    flops = 2 * b * L * Ep * (4 * Ep + 2 * Fp) + 4 * b * L * L * E
    transcendentals = b * L * (num_heads * L + Fp)
    bytes_accessed = (2 * b * L * Ep) * 4 + (4 * Ep * Ep + 2 * Ep * Fp) * 2 \
                     + (6 * Ep + Fp) * 4 + b * L * 4

    out = pl.pallas_call(
        kernel,
        out_shape=jax.ShapeDtypeStruct((b, L, Ep), jnp.float32),
        grid=(b // Bb,),
        in_specs=[
            pl.BlockSpec((Bb, L, Ep), per_b3),       # token slab (f32, lane-padded)
            pl.BlockSpec((Bb, 1, L), per_b3),        # additive key-padding bias
            pl.BlockSpec((1, Ep), full),             # layernorm gamma
            pl.BlockSpec((1, Ep), full),             # layernorm beta
            pl.BlockSpec((Ep, 3 * Ep), full),        # in_proj  (bf16)
            pl.BlockSpec((1, 3 * Ep), full),
            pl.BlockSpec((Ep, Ep), full),            # out_proj (bf16)
            pl.BlockSpec((1, Ep), full),
            pl.BlockSpec((Ep, Fp), full),            # ffn linear1 (bf16)
            pl.BlockSpec((1, Fp), full),
            pl.BlockSpec((Fp, Ep), full),            # ffn linear2 (bf16)
            pl.BlockSpec((1, Ep), full),
        ],
        out_specs=pl.BlockSpec((Bb, L, Ep), per_b3),
        scratch_shapes=[pltpu.VMEM((Bb, L, Ep), jnp.float32)],   # per-head attention slab
        compiler_params=pltpu.CompilerParams(
            dimension_semantics=("parallel",),
            vmem_limit_bytes=64 * 1024 * 1024),
        cost_estimate=pl.CostEstimate(
            flops=int(flops),
            transcendentals=int(transcendentals),
            bytes_accessed=int(bytes_accessed)),
    )(inputs, mask_bias,
      ln_g_p, ln_b_p,
      wqkv_p, bqkv_p,
      wo_p, bo_p,
      w1_p, b1_p,
      w2_p, b2_p)

    # recover the two streams from the permuted layout (no strided gathers)
    o_even, o_odd = out[:, :t], out[:, t:]
    ret_x = o_even[:, :, :c] + o_odd[:, :, c:E]
    ret_y = o_even[:, :, c:E] + o_odd[:, :, :c]
    return ret_x, ret_y


# ----------------------------------------------------------------------------- reference
def reference_forward(x, y, key_padding_mask, p, num_heads):
    # Pure-f32 reference that mirrors the torch module exactly (interleaved layout,
    # strided output slices, exact erf GELU).
    b, t, c = x.shape
    E, L = 2 * c, 2 * t
    even = jnp.concatenate([x, y], axis=-1)
    odd = jnp.concatenate([y, x], axis=-1)
    inputs = jnp.stack([even, odd], axis=2).reshape(b, L, E).astype(jnp.float32)
    valid_idx = (~key_padding_mask).sum(-1) * 2
    padded = jnp.arange(L)[None, :] >= valid_idx[:, None]
    bias = jnp.where(padded, -1e30, 0.0)[:, None, None, :]            # (b,1,1,L)

    mu = inputs.mean(-1, keepdims=True)
    var = ((inputs - mu) ** 2).mean(-1, keepdims=True)
    xn = (inputs - mu) / jnp.sqrt(var + 1e-5) * p["ln_g"][0] + p["ln_b"][0]
    qkv = xn @ p["wqkv"] + p["bqkv"][0]
    q, k, v = qkv[..., :E], qkv[..., E:2 * E], qkv[..., 2 * E:]
    hd = E // num_heads
    split = lambda z: z.reshape(b, L, num_heads, hd).transpose(0, 2, 1, 3)
    qh, kh, vh = split(q) * (1.0 / (hd ** 0.5)), split(k), split(v)
    s = jnp.einsum("bhqd,bhkd->bhqk", qh, kh) + bias
    pr = jax.nn.softmax(s, axis=-1)
    o = jnp.einsum("bhqk,bhkd->bhqd", pr, vh).transpose(0, 2, 1, 3).reshape(b, L, E)
    attn = o @ p["wo"] + p["bo"][0]
    h1 = attn + inputs
    ff = h1 @ p["w1"] + p["b1"][0]
    ff = 0.5 * ff * (1.0 + jax.lax.erf(ff * (2.0 ** -0.5)))
    ff = ff @ p["w2"] + p["b2"][0]
    out = ff + h1
    scan1, scan2 = out[:, :, :c], out[:, :, c:]
    return scan1[:, ::2] + scan2[:, 1::2], scan2[:, ::2] + scan1[:, 1::2]


# ----------------------------------------------------------------------------- params
def make_params(key, latent_dim, ff_size):
    E = 2 * latent_dim
    ks = jax.random.split(key, 10)
    w = lambda k, shape, s: s * jax.random.normal(k, shape, jnp.float32)
    return {
        "ln_g": 1.0 + 0.1 * jax.random.normal(ks[0], (1, E), jnp.float32),
        "ln_b": 0.1 * jax.random.normal(ks[1], (1, E), jnp.float32),
        "wqkv": w(ks[2], (E, 3 * E), E ** -0.5),
        "bqkv": w(ks[3], (1, 3 * E), 0.02),
        "wo":   w(ks[4], (E, E), E ** -0.5),
        "bo":   w(ks[5], (1, E), 0.02),
        "w1":   w(ks[6], (E, ff_size), E ** -0.5),
        "b1":   w(ks[7], (1, ff_size), 0.02),
        "w2":   w(ks[8], (ff_size, E), ff_size ** -0.5),
        "b2":   w(ks[9], (1, E), 0.02),
    }


if __name__ == "__main__":
    B, T, C = 2, 8, 32            # batch, time steps, latent_dim (small synthetic config)
    NUM_HEADS = 4
    FF_SIZE = 64

    key = jax.random.PRNGKey(0)
    kx, ky, kp = jax.random.split(key, 3)
    x = jax.random.normal(kx, (B, T, C), jnp.float32)
    y = jax.random.normal(ky, (B, T, C), jnp.float32)
    # True == padded; padding at the tail (as the module's mask construction assumes)
    key_padding_mask = jnp.array(
        [[False] * 6 + [True] * 2,
         [False] * 5 + [True] * 3], dtype=bool)

    params = make_params(kp, C, FF_SIZE)

    rx, ry = timotion_block_forward(x, y, key_padding_mask, params, NUM_HEADS)
    jax.block_until_ready((rx, ry))

    ref_rx, ref_ry = reference_forward(x, y, key_padding_mask, params, NUM_HEADS)

    def rel_err(a, b):
        return float(jnp.linalg.norm(a - b) / (jnp.linalg.norm(b) + 1e-8))

    assert rx.shape == (B, T, C) and ry.shape == (B, T, C)
    # bf16 MXU operands (f32 accumulation) + approx reciprocal -> bf16-appropriate tolerance
    assert rel_err(rx, ref_rx) < 2e-2, "x-stream output mismatch"
    assert rel_err(ry, ref_ry) < 2e-2, "y-stream output mismatch"
    assert jnp.allclose(rx, ref_rx, atol=1e-1, rtol=1e-1), "x-stream output mismatch"
    assert jnp.allclose(ry, ref_ry, atol=1e-1, rtol=1e-1), "y-stream output mismatch"
    print("KERNEL_OK")
</pallas_src>

<mosaic_0001>
module attributes {stable_mosaic.version = 11 : i64} {
  func.func @_timotion_kernel(%arg0: i32, %arg1: memref<1x16x128xf32, #tpu.memory_space<vmem>>, %arg2: memref<1x1x16xf32, #tpu.memory_space<vmem>>, %arg3: memref<1x128xf32, #tpu.memory_space<vmem>>, %arg4: memref<1x128xf32, #tpu.memory_space<vmem>>, %arg5: memref<128x384xbf16, #tpu.memory_space<vmem>>, %arg6: memref<1x384xf32, #tpu.memory_space<vmem>>, %arg7: memref<128x128xbf16, #tpu.memory_space<vmem>>, %arg8: memref<1x128xf32, #tpu.memory_space<vmem>>, %arg9: memref<128x128xbf16, #tpu.memory_space<vmem>>, %arg10: memref<1x128xf32, #tpu.memory_space<vmem>>, %arg11: memref<128x128xbf16, #tpu.memory_space<vmem>>, %arg12: memref<1x128xf32, #tpu.memory_space<vmem>>, %arg13: memref<1x16x128xf32, #tpu.memory_space<vmem>>, %arg14: memref<1x16x128xf32, #tpu.memory_space<vmem>>) attributes {dimension_semantics = [#tpu.dimension_semantics<parallel>], iteration_bounds = array<i64: 2>, scalar_prefetch = 0 : i64, scratch_operands = 1 : i64, tpu.core_type = #tpu.core_type<tc>, window_params = [{transform_indices = @transform_0, window_bounds = array<i64: 1, 16, 128>}, {transform_indices = @transform_1, window_bounds = array<i64: 1, 1, 16>}, {pipeline_mode = #tpu.pipeline_mode<synchronous>, transform_indices = @transform_2, window_bounds = array<i64: 1, 128>}, {pipeline_mode = #tpu.pipeline_mode<synchronous>, transform_indices = @transform_3, window_bounds = array<i64: 1, 128>}, {pipeline_mode = #tpu.pipeline_mode<synchronous>, transform_indices = @transform_4, window_bounds = array<i64: 128, 384>}, {pipeline_mode = #tpu.pipeline_mode<synchronous>, transform_indices = @transform_5, window_bounds = array<i64: 1, 384>}, {pipeline_mode = #tpu.pipeline_mode<synchronous>, transform_indices = @transform_6, window_bounds = array<i64: 128, 128>}, {pipeline_mode = #tpu.pipeline_mode<synchronous>, transform_indices = @transform_7, window_bounds = array<i64: 1, 128>}, {pipeline_mode = #tpu.pipeline_mode<synchronous>, transform_indices = @transform_8, window_bounds = array<i64: 128, 128>}, {pipeline_mode = #tpu.pipeline_mode<synchronous>, transform_indices = @transform_9, window_bounds = array<i64: 1, 128>}, {pipeline_mode = #tpu.pipeline_mode<synchronous>, transform_indices = @transform_10, window_bounds = array<i64: 128, 128>}, {pipeline_mode = #tpu.pipeline_mode<synchronous>, transform_indices = @transform_11, window_bounds = array<i64: 1, 128>}, {transform_indices = @transform_12, window_bounds = array<i64: 1, 16, 128>}]} {
    %c0 = arith.constant 0 : index
    %c0_0 = arith.constant 0 : index
    %c0_1 = arith.constant 0 : index
    %0 = vector.load %arg1[%c0, %c0_0, %c0_1] : memref<1x16x128xf32, #tpu.memory_space<vmem>>, vector<1x16x128xf32>
    %1 = vector.shape_cast %0 : vector<1x16x128xf32> to vector<16x128xf32>
    %c0_2 = arith.constant 0 : index
    %c0_3 = arith.constant 0 : index
    %c0_4 = arith.constant 0 : index
    %2 = vector.load %arg2[%c0_2, %c0_3, %c0_4] : memref<1x1x16xf32, #tpu.memory_space<vmem>>, vector<1x1x16xf32>
    %cst = arith.constant dense<0.000000e+00> : vector<16xf32>
    %3 = vector.multi_reduction <add>, %1, %cst [1] : vector<16x128xf32> to vector<16xf32>
    %4 = vector.shape_cast %3 : vector<16xf32> to vector<16x1xf32>
    %cst_5 = arith.constant 1.562500e-02 : f32
    %5 = vector.broadcast %cst_5 : f32 to vector<16x1xf32>
    %6 = arith.mulf %4, %5 : vector<16x1xf32>
    %7 = arith.mulf %1, %1 : vector<16x128xf32>
    %cst_6 = arith.constant dense<0.000000e+00> : vector<16xf32>
    %8 = vector.multi_reduction <add>, %7, %cst_6 [1] : vector<16x128xf32> to vector<16xf32>
    %9 = vector.shape_cast %8 : vector<16xf32> to vector<16x1xf32>
    %cst_7 = arith.constant 1.562500e-02 : f32
    %10 = vector.broadcast %cst_7 : f32 to vector<16x1xf32>
    %11 = arith.mulf %9, %10 : vector<16x1xf32>
    %12 = arith.mulf %6, %6 : vector<16x1xf32>
    %13 = arith.subf %11, %12 : vector<16x1xf32>
    %14 = vector.broadcast %6 : vector<16x1xf32> to vector<16x128xf32>
    %15 = arith.subf %1, %14 : vector<16x128xf32>
    %cst_8 = arith.constant 9.99999974E-6 : f32
    %16 = vector.broadcast %cst_8 : f32 to vector<16x1xf32>
    %17 = arith.addf %13, %16 : vector<16x1xf32>
    %18 = math.rsqrt %17 : vector<16x1xf32>
    %19 = vector.broadcast %18 : vector<16x1xf32> to vector<16x128xf32>
    %20 = arith.mulf %15, %19 : vector<16x128xf32>
    %c0_9 = arith.constant 0 : index
    %c0_10 = arith.constant 0 : index
    %21 = vector.load %arg3[%c0_9, %c0_10] : memref<1x128xf32, #tpu.memory_space<vmem>>, vector<1x128xf32>
    %22 = vector.broadcast %21 : vector<1x128xf32> to vector<16x128xf32>
    %23 = arith.mulf %20, %22 : vector<16x128xf32>
    %c0_11 = arith.constant 0 : index
    %c0_12 = arith.constant 0 : index
    %24 = vector.load %arg4[%c0_11, %c0_12] : memref<1x128xf32, #tpu.memory_space<vmem>>, vector<1x128xf32>
    %25 = vector.broadcast %24 : vector<1x128xf32> to vector<16x128xf32>
    %26 = arith.addf %23, %25 : vector<16x128xf32>
    %27 = arith.truncf %26 : vector<16x128xf32> to vector<16x128xbf16>
    %c0_13 = arith.constant 0 : index
    %c0_14 = arith.constant 0 : index
    %28 = vector.load %arg5[%c0_13, %c0_14] : memref<128x384xbf16, #tpu.memory_space<vmem>>, vector<128x384xbf16>
    %cst_15 = arith.constant dense<0.000000e+00> : vector<16x384xf32>
    %29 = tpu.matmul %27, %28, %cst_15 {dimension_numbers = #tpu.dot_dimension_numbers<[1], [0], [0], [1], [0, 0, 1, 1], [], []>} : vector<16x128xbf16>, vector<128x384xbf16>, vector<16x384xf32> -> vector<16x384xf32>
    %c0_16 = arith.constant 0 : index
    %c0_17 = arith.constant 0 : index
    %30 = vector.load %arg6[%c0_16, %c0_17] : memref<1x384xf32, #tpu.memory_space<vmem>>, vector<1x384xf32>
    %31 = vector.broadcast %30 : vector<1x384xf32> to vector<16x384xf32>
    %32 = arith.addf %29, %31 : vector<16x384xf32>
    %33 = vector.extract_strided_slice %32 {offsets = [0, 0], sizes = [16, 128], strides = [1, 1]} : vector<16x384xf32> to vector<16x128xf32>
    %cst_18 = arith.constant 2.500000e-01 : f32
    %34 = vector.broadcast %cst_18 : f32 to vector<16x128xf32>
    %35 = arith.mulf %33, %34 : vector<16x128xf32>
    %36 = arith.truncf %35 : vector<16x128xf32> to vector<16x128xbf16>
    %37 = vector.shape_cast %36 : vector<16x128xbf16> to vector<1x16x128xbf16>
    %38 = vector.extract_strided_slice %32 {offsets = [0, 128], sizes = [16, 128], strides = [1, 1]} : vector<16x384xf32> to vector<16x128xf32>
    %39 = arith.truncf %38 : vector<16x128xf32> to vector<16x128xbf16>
    %40 = vector.shape_cast %39 : vector<16x128xbf16> to vector<1x16x128xbf16>
    %41 = vector.extract_strided_slice %32 {offsets = [0, 256], sizes = [16, 128], strides = [1, 1]} : vector<16x384xf32> to vector<16x128xf32>
    %42 = arith.truncf %41 : vector<16x128xf32> to vector<16x128xbf16>
    %43 = vector.shape_cast %42 : vector<16x128xbf16> to vector<1x16x128xbf16>
    %cst_19 = arith.constant 0.000000e+00 : f32
    %44 = vector.broadcast %cst_19 : f32 to vector<1x16x128xf32>
    %c0_20 = arith.constant 0 : index
    %c0_21 = arith.constant 0 : index
    %c0_22 = arith.constant 0 : index
    %45 = vector.load %arg14[%c0_20, %c0_21, %c0_22] : memref<1x16x128xf32, #tpu.memory_space<vmem>>, vector<1x16x128xf32>
    tpu.vector_store %arg14[%c0_20, %c0_21, %c0_22], %44 {strides = array<i32>} : memref<1x16x128xf32, #tpu.memory_space<vmem>>, vector<1x16x128xf32>,
    %46 = vector.extract_strided_slice %37 {offsets = [0, 0, 0], sizes = [1, 16, 16], strides = [1, 1, 1]} : vector<1x16x128xbf16> to vector<1x16x16xbf16>
    %47 = vector.extract_strided_slice %40 {offsets = [0, 0, 0], sizes = [1, 16, 16], strides = [1, 1, 1]} : vector<1x16x128xbf16> to vector<1x16x16xbf16>
    "tpu.trace_start"() <{level = 10 : i32, message = "bqd,bkd->bqk"}> : () -> ()
    %cst_23 = arith.constant dense<0.000000e+00> : vector<1x16x16xf32>
    %48 = tpu.matmul %46, %47, %cst_23 {dimension_numbers = #tpu.dot_dimension_numbers<[2], [2], [1], [1], [0, 0, 0, 1, 1, 1], [0], [0]>} : vector<1x16x16xbf16>, vector<1x16x16xbf16>, vector<1x16x16xf32> -> vector<1x16x16xf32>
    "tpu.trace_stop"() : () -> ()
    %49 = vector.broadcast %2 : vector<1x1x16xf32> to vector<1x16x16xf32>
    %50 = arith.addf %48, %49 : vector<1x16x16xf32>
    %cst_24 = arith.constant dense<0xFF800000> : vector<1x16xf32>
    %51 = vector.multi_reduction <maximumf>, %50, %cst_24 [2] : vector<1x16x16xf32> to vector<1x16xf32>
    %52 = vector.shape_cast %51 : vector<1x16xf32> to vector<1x16x1xf32>
    %53 = vector.broadcast %52 : vector<1x16x1xf32> to vector<1x16x16xf32>
    %54 = arith.subf %50, %53 : vector<1x16x16xf32>
    %55 = math.exp %54 : vector<1x16x16xf32>
    %cst_25 = arith.constant dense<0.000000e+00> : vector<1x16xf32>
    %56 = vector.multi_reduction <add>, %55, %cst_25 [2] : vector<1x16x16xf32> to vector<1x16xf32>
    %57 = vector.shape_cast %56 : vector<1x16xf32> to vector<1x16x1xf32>
    %58 = tpu.reciprocal %57 {approx = true} : vector<1x16x1xf32> -> vector<1x16x1xf32>
    %59 = vector.broadcast %58 : vector<1x16x1xf32> to vector<1x16x16xf32>
    %60 = arith.mulf %55, %59 : vector<1x16x16xf32>
    %61 = arith.truncf %60 : vector<1x16x16xf32> to vector<1x16x16xbf16>
    %62 = vector.extract_strided_slice %43 {offsets = [0, 0, 0], sizes = [1, 16, 16], strides = [1, 1, 1]} : vector<1x16x128xbf16> to vector<1x16x16xbf16>
    "tpu.trace_start"() <{level = 10 : i32, message = "bqk,bkd->bqd"}> : () -> ()
    %cst_26 = arith.constant dense<0.000000e+00> : vector<1x16x16xf32>
    %63 = tpu.matmul %61, %62, %cst_26 {dimension_numbers = #tpu.dot_dimension_numbers<[2], [1], [1], [2], [0, 0, 0, 1, 1, 2], [0], [0]>} : vector<1x16x16xbf16>, vector<1x16x16xbf16>, vector<1x16x16xf32> -> vector<1x16x16xf32>
    "tpu.trace_stop"() : () -> ()
    %c0_27 = arith.constant 0 : index
    %c0_28 = arith.constant 0 : index
    %c0_29 = arith.constant 0 : index
    %64 = vector.load %arg14[%c0_27, %c0_28, %c0_29] : memref<1x16x128xf32, #tpu.memory_space<vmem>>, vector<1x16x16xf32>
    tpu.vector_store %arg14[%c0_27, %c0_28, %c0_29], %63 {strides = array<i32>} : memref<1x16x128xf32, #tpu.memory_space<vmem>>, vector<1x16x16xf32>,
    %65 = vector.extract_strided_slice %37 {offsets = [0, 0, 16], sizes = [1, 16, 16], strides = [1, 1, 1]} : vector<1x16x128xbf16> to vector<1x16x16xbf16>
    %66 = vector.extract_strided_slice %40 {offsets = [0, 0, 16], sizes = [1, 16, 16], strides = [1, 1, 1]} : vector<1x16x128xbf16> to vector<1x16x16xbf16>
    "tpu.trace_start"() <{level = 10 : i32, message = "bqd,bkd->bqk"}> : () -> ()
    %cst_30 = arith.constant dense<0.000000e+00> : vector<1x16x16xf32>
    %67 = tpu.matmul %65, %66, %cst_30 {dimension_numbers = #tpu.dot_dimension_numbers<[2], [2], [1], [1], [0, 0, 0, 1, 1, 1], [0], [0]>} : vector<1x16x16xbf16>, vector<1x16x16xbf16>, vector<1x16x16xf32> -> vector<1x16x16xf32>
    "tpu.trace_stop"() : () -> ()
    %68 = vector.broadcast %2 : vector<1x1x16xf32> to vector<1x16x16xf32>
    %69 = arith.addf %67, %68 : vector<1x16x16xf32>
    %cst_31 = arith.constant dense<0xFF800000> : vector<1x16xf32>
    %70 = vector.multi_reduction <maximumf>, %69, %cst_31 [2] : vector<1x16x16xf32> to vector<1x16xf32>
    %71 = vector.shape_cast %70 : vector<1x16xf32> to vector<1x16x1xf32>
    %72 = vector.broadcast %71 : vector<1x16x1xf32> to vector<1x16x16xf32>
    %73 = arith.subf %69, %72 : vector<1x16x16xf32>
    %74 = math.exp %73 : vector<1x16x16xf32>
    %cst_32 = arith.constant dense<0.000000e+00> : vector<1x16xf32>
    %75 = vector.multi_reduction <add>, %74, %cst_32 [2] : vector<1x16x16xf32> to vector<1x16xf32>
    %76 = vector.shape_cast %75 : vector<1x16xf32> to vector<1x16x1xf32>
    %77 = tpu.reciprocal %76 {approx = true} : vector<1x16x1xf32> -> vector<1x16x1xf32>
    %78 = vector.broadcast %77 : vector<1x16x1xf32> to vector<1x16x16xf32>
    %79 = arith.mulf %74, %78 : vector<1x16x16xf32>
    %80 = arith.truncf %79 : vector<1x16x16xf32> to vector<1x16x16xbf16>
    %81 = vector.extract_strided_slice %43 {offsets = [0, 0, 16], sizes = [1, 16, 16], strides = [1, 1, 1]} : vector<1x16x128xbf16> to vector<1x16x16xbf16>
    "tpu.trace_start"() <{level = 10 : i32, message = "bqk,bkd->bqd"}> : () -> ()
    %cst_33 = arith.constant dense<0.000000e+00> : vector<1x16x16xf32>
    %82 = tpu.matmul %80, %81, %cst_33 {dimension_numbers = #tpu.dot_dimension_numbers<[2], [1], [1], [2], [0, 0, 0, 1, 1, 2], [0], [0]>} : vector<1x16x16xbf16>, vector<1x16x16xbf16>, vector<1x16x16xf32> -> vector<1x16x16xf32>
    "tpu.trace_stop"() : () -> ()
    %c0_34 = arith.constant 0 : index
    %c0_35 = arith.constant 0 : index
    %c16 = arith.constant 16 : index
    %83 = vector.load %arg14[%c0_34, %c0_35, %c16] : memref<1x16x128xf32, #tpu.memory_space<vmem>>, vector<1x16x16xf32>
    tpu.vector_store %arg14[%c0_34, %c0_35, %c16], %82 {strides = array<i32>} : memref<1x16x128xf32, #tpu.memory_space<vmem>>, vector<1x16x16xf32>,
    %84 = vector.extract_strided_slice %37 {offsets = [0, 0, 32], sizes = [1, 16, 16], strides = [1, 1, 1]} : vector<1x16x128xbf16> to vector<1x16x16xbf16>
    %85 = vector.extract_strided_slice %40 {offsets = [0, 0, 32], sizes = [1, 16, 16], strides = [1, 1, 1]} : vector<1x16x128xbf16> to vector<1x16x16xbf16>
    "tpu.trace_start"() <{level = 10 : i32, message = "bqd,bkd->bqk"}> : () -> ()
    %cst_36 = arith.constant dense<0.000000e+00> : vector<1x16x16xf32>
    %86 = tpu.matmul %84, %85, %cst_36 {dimension_numbers = #tpu.dot_dimension_numbers<[2], [2], [1], [1], [0, 0, 0, 1, 1, 1], [0], [0]>} : vector<1x16x16xbf16>, vector<1x16x16xbf16>, vector<1x16x16xf32> -> vector<1x16x16xf32>
    "tpu.trace_stop"() : () -> ()
    %87 = vector.broadcast %2 : vector<1x1x16xf32> to vector<1x16x16xf32>
    %88 = arith.addf %86, %87 : vector<1x16x16xf32>
    %cst_37 = arith.constant dense<0xFF800000> : vector<1x16xf32>
    %89 = vector.multi_reduction <maximumf>, %88, %cst_37 [2] : vector<1x16x16xf32> to vector<1x16xf32>
    %90 = vector.shape_cast %89 : vector<1x16xf32> to vector<1x16x1xf32>
    %91 = vector.broadcast %90 : vector<1x16x1xf32> to vector<1x16x16xf32>
    %92 = arith.subf %88, %91 : vector<1x16x16xf32>
    %93 = math.exp %92 : vector<1x16x16xf32>
    %cst_38 = arith.constant dense<0.000000e+00> : vector<1x16xf32>
    %94 = vector.multi_reduction <add>, %93, %cst_38 [2] : vector<1x16x16xf32> to vector<1x16xf32>
    %95 = vector.shape_cast %94 : vector<1x16xf32> to vector<1x16x1xf32>
    %96 = tpu.reciprocal %95 {approx = true} : vector<1x16x1xf32> -> vector<1x16x1xf32>
    %97 = vector.broadcast %96 : vector<1x16x1xf32> to vector<1x16x16xf32>
    %98 = arith.mulf %93, %97 : vector<1x16x16xf32>
    %99 = arith.truncf %98 : vector<1x16x16xf32> to vector<1x16x16xbf16>
    %100 = vector.extract_strided_slice %43 {offsets = [0, 0, 32], sizes = [1, 16, 16], strides = [1, 1, 1]} : vector<1x16x128xbf16> to vector<1x16x16xbf16>
    "tpu.trace_start"() <{level = 10 : i32, message = "bqk,bkd->bqd"}> : () -> ()
    %cst_39 = arith.constant dense<0.000000e+00> : vector<1x16x16xf32>
    %101 = tpu.matmul %99, %100, %cst_39 {dimension_numbers = #tpu.dot_dimension_numbers<[2], [1], [1], [2], [0, 0, 0, 1, 1, 2], [0], [0]>} : vector<1x16x16xbf16>, vector<1x16x16xbf16>, vector<1x16x16xf32> -> vector<1x16x16xf32>
    "tpu.trace_stop"() : () -> ()
    %c0_40 = arith.constant 0 : index
    %c0_41 = arith.constant 0 : index
    %c32 = arith.constant 32 : index
    %102 = vector.load %arg14[%c0_40, %c0_41, %c32] : memref<1x16x128xf32, #tpu.memory_space<vmem>>, vector<1x16x16xf32>
    tpu.vector_store %arg14[%c0_40, %c0_41, %c32], %101 {strides = array<i32>} : memref<1x16x128xf32, #tpu.memory_space<vmem>>, vector<1x16x16xf32>,
    %103 = vector.extract_strided_slice %37 {offsets = [0, 0, 48], sizes = [1, 16, 16], strides = [1, 1, 1]} : vector<1x16x128xbf16> to vector<1x16x16xbf16>
    %104 = vector.extract_strided_slice %40 {offsets = [0, 0, 48], sizes = [1, 16, 16], strides = [1, 1, 1]} : vector<1x16x128xbf16> to vector<1x16x16xbf16>
    "tpu.trace_start"() <{level = 10 : i32, message = "bqd,bkd->bqk"}> : () -> ()
    %cst_42 = arith.constant dense<0.000000e+00> : vector<1x16x16xf32>
    %105 = tpu.matmul %103, %104, %cst_42 {dimension_numbers = #tpu.dot_dimension_numbers<[2], [2], [1], [1], [0, 0, 0, 1, 1, 1], [0], [0]>} : vector<1x16x16xbf16>, vector<1x16x16xbf16>, vector<1x16x16xf32> -> vector<1x16x16xf32>
    "tpu.trace_stop"() : () -> ()
    %106 = vector.broadcast %2 : vector<1x1x16xf32> to vector<1x16x16xf32>
    %107 = arith.addf %105, %106 : vector<1x16x16xf32>
    %cst_43 = arith.constant dense<0xFF800000> : vector<1x16xf32>
    %108 = vector.multi_reduction <maximumf>, %107, %cst_43 [2] : vector<1x16x16xf32> to vector<1x16xf32>
    %109 = vector.shape_cast %108 : vector<1x16xf32> to vector<1x16x1xf32>
    %110 = vector.broadcast %109 : vector<1x16x1xf32> to vector<1x16x16xf32>
    %111 = arith.subf %107, %110 : vector<1x16x16xf32>
    %112 = math.exp %111 : vector<1x16x16xf32>
    %cst_44 = arith.constant dense<0.000000e+00> : vector<1x16xf32>
    %113 = vector.multi_reduction <add>, %112, %cst_44 [2] : vector<1x16x16xf32> to vector<1x16xf32>
    %114 = vector.shape_cast %113 : vector<1x16xf32> to vector<1x16x1xf32>
    %115 = tpu.reciprocal %114 {approx = true} : vector<1x16x1xf32> -> vector<1x16x1xf32>
    %116 = vector.broadcast %115 : vector<1x16x1xf32> to vector<1x16x16xf32>
    %117 = arith.mulf %112, %116 : vector<1x16x16xf32>
    %118 = arith.truncf %117 : vector<1x16x16xf32> to vector<1x16x16xbf16>
    %119 = vector.extract_strided_slice %43 {offsets = [0, 0, 48], sizes = [1, 16, 16], strides = [1, 1, 1]} : vector<1x16x128xbf16> to vector<1x16x16xbf16>
    "tpu.trace_start"() <{level = 10 : i32, message = "bqk,bkd->bqd"}> : () -> ()
    %cst_45 = arith.constant dense<0.000000e+00> : vector<1x16x16xf32>
    %120 = tpu.matmul %118, %119, %cst_45 {dimension_numbers = #tpu.dot_dimension_numbers<[2], [1], [1], [2], [0, 0, 0, 1, 1, 2], [0], [0]>} : vector<1x16x16xbf16>, vector<1x16x16xbf16>, vector<1x16x16xf32> -> vector<1x16x16xf32>
    "tpu.trace_stop"() : () -> ()
    %c0_46 = arith.constant 0 : index
    %c0_47 = arith.constant 0 : index
    %c48 = arith.constant 48 : index
    %121 = vector.load %arg14[%c0_46, %c0_47, %c48] : memref<1x16x128xf32, #tpu.memory_space<vmem>>, vector<1x16x16xf32>
    tpu.vector_store %arg14[%c0_46, %c0_47, %c48], %120 {strides = array<i32>} : memref<1x16x128xf32, #tpu.memory_space<vmem>>, vector<1x16x16xf32>,
    %c0_48 = arith.constant 0 : index
    %c0_49 = arith.constant 0 : index
    %c0_50 = arith.constant 0 : index
    %122 = vector.load %arg14[%c0_48, %c0_49, %c0_50] : memref<1x16x128xf32, #tpu.memory_space<vmem>>, vector<1x16x128xf32>
    %123 = vector.shape_cast %122 : vector<1x16x128xf32> to vector<16x128xf32>
    %124 = arith.truncf %123 : vector<16x128xf32> to vector<16x128xbf16>
    %c0_51 = arith.constant 0 : index
    %c0_52 = arith.constant 0 : index
    %125 = vector.load %arg7[%c0_51, %c0_52] : memref<128x128xbf16, #tpu.memory_space<vmem>>, vector<128x128xbf16>
    %cst_53 = arith.constant dense<0.000000e+00> : vector<16x128xf32>
    %126 = tpu.matmul %124, %125, %cst_53 {dimension_numbers = #tpu.dot_dimension_numbers<[1], [0], [0], [1], [0, 0, 1, 1], [], []>} : vector<16x128xbf16>, vector<128x128xbf16>, vector<16x128xf32> -> vector<16x128xf32>
    %c0_54 = arith.constant 0 : index
    %c0_55 = arith.constant 0 : index
    %127 = vector.load %arg8[%c0_54, %c0_55] : memref<1x128xf32, #tpu.memory_space<vmem>>, vector<1x128xf32>
    %128 = vector.broadcast %127 : vector<1x128xf32> to vector<16x128xf32>
    %129 = arith.addf %126, %128 : vector<16x128xf32>
    %130 = arith.addf %129, %1 : vector<16x128xf32>
    %131 = arith.truncf %130 : vector<16x128xf32> to vector<16x128xbf16>
    %c0_56 = arith.constant 0 : index
    %c0_57 = arith.constant 0 : index
    %132 = vector.load %arg9[%c0_56, %c0_57] : memref<128x128xbf16, #tpu.memory_space<vmem>>, vector<128x128xbf16>
    %cst_58 = arith.constant dense<0.000000e+00> : vector<16x128xf32>
    %133 = tpu.matmul %131, %132, %cst_58 {dimension_numbers = #tpu.dot_dimension_numbers<[1], [0], [0], [1], [0, 0, 1, 1], [], []>} : vector<16x128xbf16>, vector<128x128xbf16>, vector<16x128xf32> -> vector<16x128xf32>
    %c0_59 = arith.constant 0 : index
    %c0_60 = arith.constant 0 : index
    %134 = vector.load %arg10[%c0_59, %c0_60] : memref<1x128xf32, #tpu.memory_space<vmem>>, vector<1x128xf32>
    %135 = vector.broadcast %134 : vector<1x128xf32> to vector<16x128xf32>
    %136 = arith.addf %133, %135 : vector<16x128xf32>
    %cst_61 = arith.constant 5.000000e-01 : f32
    %137 = vector.broadcast %cst_61 : f32 to vector<16x128xf32>
    %138 = arith.mulf %137, %136 : vector<16x128xf32>
    %cst_62 = arith.constant 0.707106769 : f32
    %139 = vector.broadcast %cst_62 : f32 to vector<16x128xf32>
    %140 = arith.mulf %136, %139 : vector<16x128xf32>
    %141 = math.erf %140 : vector<16x128xf32>
    %cst_63 = arith.constant 1.000000e+00 : f32
    %142 = vector.broadcast %cst_63 : f32 to vector<16x128xf32>
    %143 = arith.addf %142, %141 : vector<16x128xf32>
    %144 = arith.mulf %138, %143 : vector<16x128xf32>
    %145 = arith.truncf %144 : vector<16x128xf32> to vector<16x128xbf16>
    %c0_64 = arith.constant 0 : index
    %c0_65 = arith.constant 0 : index
    %146 = vector.load %arg11[%c0_64, %c0_65] : memref<128x128xbf16, #tpu.memory_space<vmem>>, vector<128x128xbf16>
    %cst_66 = arith.constant dense<0.000000e+00> : vector<16x128xf32>
    %147 = tpu.matmul %145, %146, %cst_66 {dimension_numbers = #tpu.dot_dimension_numbers<[1], [0], [0], [1], [0, 0, 1, 1], [], []>} : vector<16x128xbf16>, vector<128x128xbf16>, vector<16x128xf32> -> vector<16x128xf32>
    %c0_67 = arith.constant 0 : index
    %c0_68 = arith.constant 0 : index
    %148 = vector.load %arg12[%c0_67, %c0_68] : memref<1x128xf32, #tpu.memory_space<vmem>>, vector<1x128xf32>
    %149 = vector.broadcast %148 : vector<1x128xf32> to vector<16x128xf32>
    %150 = arith.addf %147, %149 : vector<16x128xf32>
    %151 = arith.addf %150, %130 : vector<16x128xf32>
    %152 = vector.shape_cast %151 : vector<16x128xf32> to vector<1x16x128xf32>
    %c0_69 = arith.constant 0 : index
    %c0_70 = arith.constant 0 : index
    %c0_71 = arith.constant 0 : index
    %153 = vector.load %arg13[%c0_69, %c0_70, %c0_71] : memref<1x16x128xf32, #tpu.memory_space<vmem>>, vector<1x16x128xf32>
    tpu.vector_store %arg13[%c0_69, %c0_70, %c0_71], %152 {strides = array<i32>} : memref<1x16x128xf32, #tpu.memory_space<vmem>>, vector<1x16x128xf32>,
    return
  }
  func.func @transform_0(%arg0: i32) -> (i32, i32, i32) {
    %c0_i32 = arith.constant 0 : i32
    %c0_i32_0 = arith.constant 0 : i32
    %c0_i32_1 = arith.constant 0 : i32
    return %arg0, %c0_i32, %c0_i32_0 : i32, i32, i32
  }
  func.func @transform_1(%arg0: i32) -> (i32, i32, i32) {
    %c0_i32 = arith.constant 0 : i32
    %c0_i32_0 = arith.constant 0 : i32
    %c0_i32_1 = arith.constant 0 : i32
    return %arg0, %c0_i32, %c0_i32_0 : i32, i32, i32
  }
  func.func @transform_2(%arg0: i32) -> (i32, i32) {
    %c0_i32 = arith.constant 0 : i32
    %c0_i32_0 = arith.constant 0 : i32
    %c0_i32_1 = arith.constant 0 : i32
    return %c0_i32, %c0_i32_0 : i32, i32
  }
  func.func @transform_3(%arg0: i32) -> (i32, i32) {
    %c0_i32 = arith.constant 0 : i32
    %c0_i32_0 = arith.constant 0 : i32
    %c0_i32_1 = arith.constant 0 : i32
    return %c0_i32, %c0_i32_0 : i32, i32
  }
  func.func @transform_4(%arg0: i32) -> (i32, i32) {
    %c0_i32 = arith.constant 0 : i32
    %c0_i32_0 = arith.constant 0 : i32
    %c0_i32_1 = arith.constant 0 : i32
    return %c0_i32, %c0_i32_0 : i32, i32
  }
  func.func @transform_5(%arg0: i32) -> (i32, i32) {
    %c0_i32 = arith.constant 0 : i32
    %c0_i32_0 = arith.constant 0 : i32
    %c0_i32_1 = arith.constant 0 : i32
    return %c0_i32, %c0_i32_0 : i32, i32
  }
  func.func @transform_6(%arg0: i32) -> (i32, i32) {
    %c0_i32 = arith.constant 0 : i32
    %c0_i32_0 = arith.constant 0 : i32
    %c0_i32_1 = arith.constant 0 : i32
    return %c0_i32, %c0_i32_0 : i32, i32
  }
  func.func @transform_7(%arg0: i32) -> (i32, i32) {
    %c0_i32 = arith.constant 0 : i32
    %c0_i32_0 = arith.constant 0 : i32
    %c0_i32_1 = arith.constant 0 : i32
    return %c0_i32, %c0_i32_0 : i32, i32
  }
  func.func @transform_8(%arg0: i32) -> (i32, i32) {
    %c0_i32 = arith.constant 0 : i32
    %c0_i32_0 = arith.constant 0 : i32
    %c0_i32_1 = arith.constant 0 : i32
    return %c0_i32, %c0_i32_0 : i32, i32
  }
  func.func @transform_9(%arg0: i32) -> (i32, i32) {
    %c0_i32 = arith.constant 0 : i32
    %c0_i32_0 = arith.constant 0 : i32
    %c0_i32_1 = arith.constant 0 : i32
    return %c0_i32, %c0_i32_0 : i32, i32
  }
  func.func @transform_10(%arg0: i32) -> (i32, i32) {
    %c0_i32 = arith.constant 0 : i32
    %c0_i32_0 = arith.constant 0 : i32
    %c0_i32_1 = arith.constant 0 : i32
    return %c0_i32, %c0_i32_0 : i32, i32
  }
  func.func @transform_11(%arg0: i32) -> (i32, i32) {
    %c0_i32 = arith.constant 0 : i32
    %c0_i32_0 = arith.constant 0 : i32
    %c0_i32_1 = arith.constant 0 : i32
    return %c0_i32, %c0_i32_0 : i32, i32
  }
  func.func @transform_12(%arg0: i32) -> (i32, i32, i32) {
    %c0_i32 = arith.constant 0 : i32
    %c0_i32_0 = arith.constant 0 : i32
    %c0_i32_1 = arith.constant 0 : i32
    return %arg0, %c0_i32, %c0_i32_0 : i32, i32, i32
  }
}

</mosaic_0001>

<bundles_post_ra>
// kernel: tpu_custom_call.1
= control target key start
LH: loop header
LB: loop body
LE: loop exit
PB: predicated region body
PF: predicated region fallthrough
CT: control target
= control target key end

     0   :  { %s2812_s0 = inlined_call_operand.hbm [shape: f32[2,16,128], index: 0, kind: input, shape index: {}]   ;;  %s2813_s1 = inlined_call_operand.hbm [shape: f32[2,1,16], index: 1, kind: input, shape index: {}]   ;;  %s2814_s2 = inlined_call_operand.vmem [shape: f32[1,128], index: 2, kind: input, shape index: {}]   ;;  %s2815_s3 = inlined_call_operand.hbm [shape: f32[1,128], index: 3, kind: input, shape index: {}]   ;;  %s2816_s4 = inlined_call_operand.hbm [shape: bf16[128,384], index: 4, kind: input, shape index: {}]   ;;  %s2817_s5 = inlined_call_operand.vmem [shape: f32[1,384], index: 5, kind: input, shape index: {}]   ;;  %s2818_s6 = inlined_call_operand.hbm [shape: bf16[128,128], index: 6, kind: input, shape index: {}]   ;;  %s2819_s7 = inlined_call_operand.vmem [shape: f32[1,128], index: 7, kind: input, shape index: {}]   ;;  %s2820_s8 = inlined_call_operand.hbm [shape: bf16[128,128], index: 8, kind: input, shape index: {}]   ;;  %s2821_s9 = inlined_call_operand.vmem [shape: f32[1,128], index: 9, kind: input, shape index: {}]   ;;  %s2822_s10 = inlined_call_operand.hbm [shape: bf16[128,128], index: 10, kind: input, shape index: {}]   ;;  %s2823_s11 = inlined_call_operand.vmem [shape: f32[1,128], index: 11, kind: input, shape index: {}]   ;;  %s2824_s12 = inlined_call_operand.hbm [shape: f32[2,16,128], index: 12, kind: output, shape index: {}]  }
   0x1   :  { %2831 = sst [smem:[#allocation27_spill]] %s2815_s3 }
   0x2   :  { %2832 = sst [smem:[#allocation28_spill]] %s2816_s4 }
   0x3   :  { %2833 = sst [smem:[#allocation29_spill]] %s2818_s6 }
   0x4   :  { %2834 = sst [smem:[#allocation30_spill]] %s2820_s8 }
   0x5   :  { %2835 = sst [smem:[#allocation31_spill]] %s2822_s10 }
   0x6   :  { %2836 = sst [smem:[#allocation32_spill]] %s2824_s12 }
   0x7   :  { %17 = vsyncpa [#allocation4], 0 }
   0x8   :  { %19 = vsyncpa [#allocation4 + $0x1], 0 }
   0x9   :  { %20 = vsyncpa [#allocation7], 0 }
   0xa   :  { %22 = vsyncpa [#allocation7 + $0x1], 0 }
   0xb   :  { %23 = vsyncpa [#allocation10], 0 }
   0xc   :  { %24 = vsyncpa [#allocation13], 0 }
   0xd   :  { %25 = vsyncpa [#allocation5], 0 }
   0xe   :  { %27 = vsyncpa [#allocation5 + $0x1], 0  ;;  %s2488_s21 = smov 0   ;;  %s2490_s22 = smov 0  }
   0xf   :  { %s2492_s23 = smov 0   ;;  %s2494_s24 = smov 0  }
  0x10 LB: > { %2837 = sst [smem:[#allocation22_spill]] %s2389_s21  ;;  %s2512_s28 = sadd.s32 4294967295, %s2401_s24   ;;  %s2401_s24 = sphi %s2494_s24, %s2858_s24   ;;  %s2397_s23 = sphi %s2492_s23, %s2860_s23   ;;  %s2393_s22 = sphi %s2490_s22, %s2862_s22   ;;  %s2389_s21 = sphi %s2488_s21, %s2861_s21  }
  0x11   : > { %2838 = sst [smem:[#allocation23_spill]] %s2397_s23  ;;  %p1671_p0 = scmp.ge.s32.totalorder %s2401_s24, 1 }
  0x12   : > { %s2839_s3 = sld [smem:[#allocation27_spill]]  ;;  %p54_p1 = scmp.eq.s32.totalorder %s2512_s28, 0 }
  0x13   : > { %p326_p2 = scmp.lt.s32.totalorder %s2401_s24, 3  ;;  %s2403_s30 = smov [#allocation8]  }
  0x14   : > { %s343_s13 = sshll.u32 %s2403_s30, 4  ;;  %s2841_s4 = sld [smem:[#allocation28_spill]]  ;;  %s344_s13 = int_to_ptr.vmem [resolvable:$true] %s343_s13 }
  0x15   : > { %p2517_p3 = pnand %p1671_p0, %p326_p2  ;;  %s2404_s18 = smov [#allocation9]  }
  0x16   : > { %s354_s19 = sshll.u32 %s2404_s18, 4  ;;  %s2405_s20 = smov 192   ;;  %s355_s19 = int_to_ptr.vmem [resolvable:$true] %s354_s19 }
  0x17   : > { %p1972_p5 = pneg %p2517_p3  ;;  %s2406_s25 = smov 12  }
  0x18   : > { %s341_s27 = sshll.u32 %s2839_s3, 4  ;;  %s2843_s8 = sld [smem:[#allocation30_spill]]  ;;  %s342_s27 = int_to_ptr.hbm [resolvable:$true] %s341_s27 }
  0x19   : > { %p2529_p6 = pnand %p1972_p5, %p54_p1  ;;  %s2407_s15 = smov [#allocation12]  }
  0x1a   : > { %s352_s16 = sshll.u32 %s2841_s4, 4  ;;  %s388_s3 = sshll.u32 %s2407_s15, 4  ;;  %s353_s16 = int_to_ptr.hbm [resolvable:$true] %s352_s16  ;;  %s389_s3 = int_to_ptr.vmem [resolvable:$true] %s388_s3 }
  0x1b   : > { %1975 = dma.hbm_to_vmem [thread:$0]  (!%p2529_p6), %s342_s27, 16, %s344_s13, [#allocation7]  }
  0x1c   : > { %1978 = dma.hbm_to_vmem [thread:$0]  (!%p2529_p6), %s353_s16, 3072, %s355_s19, [#allocation10], %s2405_s20, %s2405_s20, %s2406_s25  }
  0x1d   : > { %s2844_s6 = sld [smem:[#allocation29_spill]]  ;;  %s2408_s27 = smov 64  }
  0x1e   : > { %s386_s14 = sshll.u32 %s2843_s8, 4  ;;  %s2409_s13 = smov 4   ;;  %s387_s14 = int_to_ptr.hbm [resolvable:$true] %s386_s14 }
  0x1f   : > { %1984 = dma.hbm_to_vmem [thread:$0]  (!%p2529_p6), %s387_s14, 1024, %s389_s3, [#allocation13], %s2408_s27, %s2408_s27, %s2409_s13  }
  0x20   : > { %s2410_s16 = smov [#allocation11]   ;;  %s2845_s10 = sld [smem:[#allocation31_spill]] }
  0x21   : > { %s371_s19 = sshll.u32 %s2410_s16, 4  ;;  %s2411_s3 = smov [#allocation14]   ;;  %s372_s19 = int_to_ptr.vmem [resolvable:$true] %s371_s19 }
  0x22   : > { %s405_s12 = sshll.u32 %s2411_s3, 4  ;;  %s1670_s26 = sadd.s32 4294967294, %s2401_s24   ;;  %s406_s12 = int_to_ptr.vmem [resolvable:$true] %s405_s12 }
  0x23   : > { %s369_s18 = sshll.u32 %s2844_s6, 4  ;;  %s2554_s30 = sadd.s32 1, %s2401_s24   ;;  %s370_s18 = int_to_ptr.hbm [resolvable:$true] %s369_s18 }
  0x24   : > { %1981 = dma.hbm_to_vmem [thread:$0]  (!%p2529_p6), %s370_s18, 1024, %s372_s19, [#allocation10], %s2408_s27, %s2408_s27, %s2409_s13  }
  0x25   : > { %2846 = sst [smem:[#allocation24_spill]] %s2554_s30  ;;  %s40_s14 = sadd.s32 1, %s2397_s23 }
  0x26   : > { %s403_s4 = sshll.u32 %s2845_s10, 4  ;;  %s37_s15 = ssub.s32 %s2401_s24, %s2554_s30  ;;  %s404_s4 = int_to_ptr.hbm [resolvable:$true] %s403_s4 }
  0x27   : > { %1987 = dma.hbm_to_vmem [thread:$0]  (!%p2529_p6), %s404_s4, 1024, %s406_s12, [#allocation13], %s2408_s27, %s2408_s27, %s2409_s13  }
  0x28   : > { %p47_p7 = scmp.ne.s32.totalorder %s2397_s23, %s2393_s22  ;;  %p38_p8 = scmp.eq.s32.totalorder %s37_s15, 0 }
  0x29   : > { %p48_p9 = scmp.eq.s32.totalorder %s2401_s24, 0  ;;  %p53_p10 = scmp.ne.s32.totalorder %s2393_s22, %s2389_s21 }
  0x2a   : > { %p313_p11 = scmp.eq.s32.totalorder %s2512_s28, 1  ;;  %p319_p2 = scmp.eq.s32.totalorder %s1670_s26, 1 }
  0x2b   : > { %s2566_s18 = scalar_select %p38_p8, %s2397_s23, %s40_s14  }
  0x2c   : > { %p2568_p12 = por %p48_p9, %p47_p7  ;;  %p2574_p13 = por %p54_p1, %p53_p10 }
  0x2d   : > { %2847 = sst [smem:[#allocation25_spill]] %s2566_s18  ;;  %p2578_p0 = por %p313_p11, %p47_p7 }
  0x2e   : > { %p2004_p5 = scmp.lt.s32.totalorder %s2401_s24, 2  ;;  %s2584_s13 = sand.u32 1, %s2397_s23  }
  0x2f   : > { %p2586_p6 = por %p319_p2, %p53_p10  ;;  %s1678_s20 = sshll.u32 %s2584_s13, 4 }
  0x30   : > { %s1896_s25 = sshll.u32 %s2401_s24, 4  ;;  %s426_s15 = scalar_lea.vmem [#allocation3], %s1678_s20 }
  0x31   : > { %s2851_s19 = scalar_select %p2586_p6, 1, 0 }
  0x32   : > { %s431_s12 = scalar_lea.hbm %s2812_s0, %s1896_s25  ;;  %s434_s6 = sshll.u32 %s426_s15, 4  ;;  %s435_s6 = int_to_ptr.vmem [resolvable:$true] %s434_s6 }
  0x33   : > { %2852 = sst [smem:[#allocation26_spill]] %s2851_s19  ;;  %s432_s14 = sshll.u32 %s431_s12, 4  ;;  %s433_s14 = int_to_ptr.hbm [resolvable:$true] %s432_s14 }
  0x34   : > { %p2597_p7 = pnand %p2004_p5, %p2568_p12  ;;  %s444_s8 = sand.u32 1, %s2401_s24  }
  0x35   : > { %s423_s10 = scalar_lea.sflag [#allocation4], %s2584_s13  ;;  %s2259_s18 = sshra.s32 %s433_s14, 4  ;;  %s2260_s18 = int_to_ptr.hbm [resolvable:$true] %s2259_s18 }
  0x36   : > { %s2261_s23 = scalar_lea.hbm %s2260_s18, 16  ;;  %p2263_p9 = pneg %p2597_p7 }
  0x37   : > { %p2262_p8 = scmp.ne.s32.totalorder %s2260_s18, %s2261_s23  ;;  %s2266_s25 = scalar_lea.hbm %s2812_s0, 32 }
  0x38   : > { %p2267_p12 = scmp.lt.s32.totalorder %s2260_s18, %s2812_s0  ;;  %p2268_p2 = scmp.lt.s32.totalorder %s2266_s25, %s2261_s23 }
  0x39   : > { %p2264_p10 = pnand %p2263_p9, %p2262_p8 }
  0x3a   : > { %p2269_p5 = por %p2268_p2, %p2267_p12 }
  0x3b   : > { %p2265_p11 = pneg %p2264_p10 }
  0x3d   : > { %p2270_p4 = pnand %p2269_p5, %p2265_p11 }
  0x3f   : > { %2273 = shalt.err (!%p2270_p4)
}
  0x40   : > { %s2412_s12 = smov 128   ;;  %s2413_s15 = smov 8  }
  0x41   : > { %1991 = dma.hbm_to_vmem [thread:$0]  (!%p2597_p7), %s433_s14, 256, %s435_s6, %s423_s10, %s2412_s12, %s2412_s12, %s2413_s15  }
  0x42   : > { %s450_s20 = scalar_lea.hbm %s2813_s1, %s2401_s24  ;;  %s447_s21 = scalar_lea.vmem [#allocation6], %s2584_s13 }
  0x43   : > { %s452_s16 = sshll.u32 %s450_s20, 4  ;;  %s454_s4 = sshll.u32 %s447_s21, 4  ;;  %s453_s16 = int_to_ptr.hbm [resolvable:$true] %s452_s16  ;;  %s455_s4 = int_to_ptr.vmem [resolvable:$true] %s454_s4 }
  0x44   : > { %s445_s23 = scalar_lea.sflag [#allocation7], %s444_s8  ;;  %s2289_s18 = sshra.s32 %s453_s16, 4  ;;  %s2290_s18 = int_to_ptr.hbm [resolvable:$true] %s2289_s18 }
  0x45   : > { %s2291_s25 = scalar_lea.hbm %s2290_s18, 1  ;;  %s2296_s10 = scalar_lea.hbm %s2813_s1, 2 }
  0x46   : > { %p2292_p4 = scmp.ne.s32.totalorder %s2290_s18, %s2291_s25  ;;  %p2297_p11 = scmp.lt.s32.totalorder %s2290_s18, %s2813_s1 }
  0x47   : > { %p2298_p12 = scmp.lt.s32.totalorder %s2296_s10, %s2291_s25 }
  0x48   : > { %p2294_p8 = pnand %p2292_p4, %p2263_p9 }
  0x49   : > { %p2299_p2 = por %p2298_p12, %p2297_p11 }
  0x4a   : > { %p2295_p10 = pneg %p2294_p8 }
  0x4c   : > { %p2300_p5 = pnand %p2299_p2, %p2295_p10 }
  0x4e   : > { %2303 = shalt.err (!%p2300_p5)
}
  0x4f   : > { %1994 = dma.hbm_to_vmem [thread:$0]  (!%p2597_p7), %s453_s16, 16, %s455_s4, %s445_s23  }
  0x50   : > { %463 = sbr.rel (%p2517_p3) target bundleno = 1981 (0x7bd), region = 68  ;;  %s2635_s8 = sand.u32 (!%p2517_p3), 1, %s2393_s22  }
  0x51   : > { %s1682_s21 = sshll.u32 (!%p2517_p3), %s2635_s8, 4  ;;  %s466_s13 = scalar_lea.sflag (!%p2517_p3), [#allocation4], %s2635_s8 }
  0x52   : > { %s469_s14 = scalar_lea.vmem (!%p2517_p3), [#allocation3], %s1682_s21 }
  0x55   : > { %2364 = dma.done.wait (%p2574_p13), %s466_s13, 256  }
  0x56   : > { %2366 = vsyncadd (%p2574_p13), %s466_s13, 4294967040  ;;  %s475_s29 = sand.u32 1, %s2512_s28   ;;  %s478_s12 = scalar_lea.vmem [#allocation6], %s2635_s8 }
  0x57   : > { %s476_s26 = scalar_lea.sflag [#allocation7], %s475_s29 }
  0x58   : > { %2368 = dma.done.wait (%p2574_p13), %s476_s26, 16  }
  0x59   : > { %2370 = vsyncadd (%p2574_p13), %s476_s26, 4294967280 }
  0x5a   : > { %2372 = dma.done.wait (%p54_p1), [#allocation7], 16  }
  0x5b   : > { %2374 = vsyncadd (%p54_p1), [#allocation7], 4294967280 }
  0x5c   : > { %2376 = dma.done.wait (%p54_p1), [#allocation10], 4096  }
  0x5d   : > { %2378 = vsyncadd (%p54_p1), [#allocation10], 4294963200 }
  0x5e   : > { %2380 = dma.done.wait (%p54_p1), [#allocation13], 2048  }
  0x5f   : > { %2382 = vsyncadd (%p54_p1), [#allocation13], 4294965248  ;;  %v2663_v0 = vld [vmem:[%s469_s14] sm:$0xff]  ;;  %v2668_v2 = vld [vmem:[%s469_s14 + $0x8] sm:$0xff]  ;;  %vm843_vm6 = vcmask 130048   ;;  %s2414_s4 = smov 112  }
  0x60   : > { %553 = vadd.xlane.f32.xlu0 %v2663_v0  ;;  %v559_v1 = vmul.f32 %v2663_v0, %v2663_v0  ;;  %v560_v3 = vmul.f32 %v2668_v2, %v2668_v2  ;;  %v1775_v4 = vld [vmem:[#allocation9 + $0xa8] sm:$0xf]  ;;  %v1919_v5 = vld [vmem:[#allocation9 + $0xb0] sm:$0xf0]  ;;  %v1918_v6 = vld [vmem:[#allocation9 + $0xac] sm:$0xf] }
  0x61   : > { %v1776_v7 = vor.u32 %v1919_v5, %v1775_v4  ;;  %v1777_v8 = vld [vmem:[#allocation9 + $0xb4] sm:$0xf0]  ;;  %v1783_v9 = vld [vmem:[#allocation9 + $0xb0] sm:$0xf]  ;;  %v1920_v10 = vld [vmem:[#allocation9 + $0xb8] sm:$0xf0] }
  0x62   : > { %561 = vadd.xlane.f32.xlu1 %v559_v1  ;;  %v1780_v11 = vor.u32 %v1918_v6, %v1777_v8  ;;  %v1784_v12 = vor.u32 %v1920_v10, %v1783_v9  ;;  %v1763_v13 = vld [vmem:[#allocation9 + $0x90] sm:$0xf]  ;;  %v1916_v14 = vld [vmem:[#allocation9 + $0x98] sm:$0xf0]  ;;  %v1915_v15 = vld [vmem:[#allocation9 + $0x94] sm:$0xf] }
  0x63   : > { %778 = vmatpush.bf16.msra.mxu0 %v1776_v7  ;;  %v1764_v16 = vor.u32 %v1916_v14, %v1763_v13  ;;  %v1765_v17 = vld [vmem:[#allocation9 + $0x9c] sm:$0xf0]  ;;  %v1771_v18 = vld [vmem:[#allocation9 + $0x98] sm:$0xf]  ;;  %v1917_v19 = vld [vmem:[#allocation9 + $0xa0] sm:$0xf0] }
  0x64   : > { %792 = vmatpush.bf16.msra.mxu1 %v1780_v11  ;;  %806 = vmatpush.bf16.msra.mxu2 %v1784_v12  ;;  %v1768_v20 = vor.u32 %v1915_v15, %v1765_v17  ;;  %v1772_v21 = vor.u32 %v1917_v19, %v1771_v18  ;;  %v1751_v22 = vld [vmem:[#allocation9 + $0x78] sm:$0xf]  ;;  %v1913_v23 = vld [vmem:[#allocation9 + $0x80] sm:$0xf0]  ;;  %v1912_v24 = vld [vmem:[#allocation9 + $0x7c] sm:$0xf] }
  0x65   : > { %v1752_v25 = vor.u32 %v1913_v23, %v1751_v22  ;;  %v1753_v26 = vld [vmem:[#allocation9 + $0x84] sm:$0xf0]  ;;  %v1759_v27 = vld [vmem:[#allocation9 + $0x80] sm:$0xf]  ;;  %v1914_v28 = vld [vmem:[#allocation9 + $0x88] sm:$0xf0] }
  0x66   : > { %v1756_v29 = vor.u32 %v1912_v24, %v1753_v26  ;;  %v1760_v30 = vor.u32 %v1914_v28, %v1759_v27  ;;  %v1739_v31 = vld [vmem:[#allocation9 + $0x60] sm:$0xf]  ;;  %v1910_v32 = vld [vmem:[#allocation9 + $0x68] sm:$0xf0]  ;;  %v1909_v33 = vld [vmem:[#allocation9 + $0x64] sm:$0xf] }
  0x67   : > { %779 = vmatpush.bf16.msra.mxu0 %v1764_v16  ;;  %v1740_v34 = vor.u32 %v1910_v32, %v1739_v31  ;;  %v1741_v35 = vld [vmem:[#allocation9 + $0x6c] sm:$0xf0]  ;;  %v1747_v36 = vld [vmem:[#allocation9 + $0x68] sm:$0xf]  ;;  %v1911_v37 = vld [vmem:[#allocation9 + $0x70] sm:$0xf0] }
  0x68   : > { %555 = vadd.xlane.f32.xlu0 %v2668_v2  ;;  %793 = vmatpush.bf16.msra.mxu1 %v1768_v20  ;;  %v1744_v38 = vor.u32 %v1909_v33, %v1741_v35  ;;  %v1748_v39 = vor.u32 %v1911_v37, %v1747_v36  ;;  %v1727_v40 = vld [vmem:[#allocation9 + $0x48] sm:$0xf]  ;;  %v1907_v41 = vld [vmem:[#allocation9 + $0x50] sm:$0xf0]  ;;  %v1906_v42 = vld [vmem:[#allocation9 + $0x4c] sm:$0xf] }
  0x69   : > { %807 = vmatpush.bf16.msra.mxu2 %v1772_v21  ;;  %v1728_v43 = vor.u32 %v1907_v41, %v1727_v40  ;;  %v1729_v44 = vld [vmem:[#allocation9 + $0x54] sm:$0xf0]  ;;  %v1735_v45 = vld [vmem:[#allocation9 + $0x50] sm:$0xf]  ;;  %v1908_v46 = vld [vmem:[#allocation9 + $0x58] sm:$0xf0] }
  0x6a   : > { %563 = vadd.xlane.f32.xlu1 %v560_v3  ;;  %v1732_v47 = vor.u32 %v1906_v42, %v1729_v44  ;;  %v1736_v48 = vor.u32 %v1908_v46, %v1735_v45  ;;  %v1715_v49 = vld [vmem:[#allocation9 + $0x30] sm:$0xf]  ;;  %v1904_v50 = vld [vmem:[#allocation9 + $0x38] sm:$0xf0]  ;;  %v1903_v51 = vld [vmem:[#allocation9 + $0x34] sm:$0xf] }
  0x6b   : > { %780 = vmatpush.bf16.msra.mxu0 %v1752_v25  ;;  %v1716_v52 = vor.u32 %v1904_v50, %v1715_v49  ;;  %v1717_v53 = vld [vmem:[#allocation9 + $0x3c] sm:$0xf0]  ;;  %v1723_v54 = vld [vmem:[#allocation9 + $0x38] sm:$0xf]  ;;  %v1905_v55 = vld [vmem:[#allocation9 + $0x40] sm:$0xf0] }
  0x6c   : > { %794 = vmatpush.bf16.msra.mxu1 %v1756_v29  ;;  %v1720_v56 = vor.u32 %v1903_v51, %v1717_v53  ;;  %v1724_v57 = vor.u32 %v1905_v55, %v1723_v54  ;;  %v1703_v60 = vld [vmem:[#allocation9 + $0x18] sm:$0xf]  ;;  %v1901_v61 = vld [vmem:[#allocation9 + $0x20] sm:$0xf0]  ;;  %v1900_v1 = vld [vmem:[#allocation9 + $0x1c] sm:$0xf] }
  0x6d   : > { %808 = vmatpush.bf16.msra.mxu2 %v1760_v30  ;;  %v1704_v63 = vor.u32 %v1901_v61, %v1703_v60  ;;  %v1705_v3 = vld [vmem:[#allocation9 + $0x24] sm:$0xf0]  ;;  %v1711_v4 = vld [vmem:[#allocation9 + $0x20] sm:$0xf]  ;;  %v1902_v8 = vld [vmem:[#allocation9 + $0x28] sm:$0xf0] }
  0x6e   : > { %v1708_v7 = vor.u32 %v1900_v1, %v1705_v3  ;;  %v1691_v9 = vld [vmem:[#allocation9] sm:$0xf]  ;;  %v1712_v10 = vor.u32 %v1902_v8, %v1711_v4  ;;  %v1898_v11 = vld [vmem:[#allocation9 + $0x8] sm:$0xf0]  ;;  %v1897_v12 = vld [vmem:[#allocation9 + $0x4] sm:$0xf] }
  0x6f   : > { %781 = vmatpush.bf16.msra.mxu0 %v1740_v34  ;;  %v1693_v13 = vld [vmem:[#allocation9 + $0xc] sm:$0xf0]  ;;  %v1692_v15 = vor.u32 %v1898_v11, %v1691_v9  ;;  %v1699_v17 = vld [vmem:[#allocation9 + $0x8] sm:$0xf]  ;;  %v1899_v18 = vld [vmem:[#allocation9 + $0x10] sm:$0xf0] }
  0x70   : > { %795 = vmatpush.bf16.msra.mxu1 %v1744_v38  ;;  %v1696_v16 = vor.u32 %v1897_v12, %v1693_v13  ;;  %v1700_v19 = vor.u32 %v1899_v18, %v1699_v17  ;;  %v2063_v42 = vld [vmem:[%s2814_s2] ss:$0 sm:$0xff]  ;;  %s2415_s23 = smov 80   ;;  %s2416_s18 = smov 96   ;;  %vm999_vm7 = vcmask 261248   ;;  %vm1083_vm8 = vcmask 392448  }
  0x71   : > { %809 = vmatpush.bf16.msra.mxu2 %v1748_v39  ;;  %v642_v53 = vld [vmem:[%s2817_s5] sm:$0x7]  ;;  %s2418_s25 = smov 16   ;;  %s2419_s3 = smov 32   ;;  %vm1167_vm9 = vcmask 523648  }
  0x72   : > { %v646_v60 = vperm.slane %v642_v53, 2  ;;  %s2420_s6 = smov 48   ;;  %s1945_s26 = sshll.u32 %s2512_s28, 4 }
  0x73   : > { %782 = vmatpush.bf16.msra.mxu0 %v1728_v43  ;;  %s2854_s15 = sld [smem:[#allocation32_spill]]  ;;  %s548_s16 = scalar_lea.vmem [#allocation15], %s1682_s21 }
  0x74   : > { %796 = vmatpush.bf16.msra.mxu1 %v1732_v47  ;;  %s1516_s28 = scalar_lea.sflag [#allocation5], %s2635_s8 }
  0x75   : > { %810 = vmatpush.bf16.msra.mxu2 %v1736_v48  ;;  %v2064_v48 = vld [vmem:[#allocation8] ss:$0 sm:$0xff] }
  0x77   : > { %783 = vmatpush.bf16.msra.mxu0 %v1716_v52 }
  0x78   : > { %797 = vmatpush.bf16.msra.mxu1 %v1720_v56  ;;  %v645_v56 = vperm.slane %v642_v53, 1 }
  0x79   : > { %811 = vmatpush.bf16.msra.mxu2 %v1724_v57  ;;  %v644_v57 = vperm.slane %v642_v53, 0  ;;  %s1527_s20 = scalar_lea.hbm %s2854_s15, %s1945_s26 }
  0x7b   : > { %784 = vmatpush.bf16.msra.mxu0 %v1704_v63 }
  0x7c   : > { %798 = vmatpush.bf16.msra.mxu1 %v1708_v7 }
  0x7d   : > { %812 = vmatpush.bf16.msra.mxu2 %v1712_v10 }
  0x7f   : > { %785 = vmatpush.bf16.msra.mxu0 %v1692_v15 }
  0x80   : > { %799 = vmatpush.bf16.msra.mxu1 %v1696_v16 }
  0x81   : > { %813 = vmatpush.bf16.msra.mxu2 %v1700_v19 }
  0xd3   : > { %v554_v58 = vpop.xlane.xlu0 %553 }
  0xd4   : > { %v557_v59 = vmul.f32 0.015625, %v554_v58 }
  0xd5   : > { %v562_v62 = vpop.xlane.xlu1 %561 }
  0xd6   : > { %v567_v5 = vmul.f32 %v557_v59, %v557_v59  ;;  %v565_v6 = vmul.f32 0.015625, %v562_v62  ;;  %v571_v39 = vsub.f32 %v2663_v0, %v557_v59 }
  0xd8   : > { %v569_v14 = vsub.f32 %v565_v6, %v567_v5 }
  0xda   : > { %v573_v20 = vadd.f32 1e-05, %v569_v14 }
  0xdb   : > { %v556_v21 = vpop.xlane.xlu0 %555 }
  0xdc   : > { %2069 = vrsqrt.f32 %v573_v20  ;;  %v558_v22 = vmul.f32 0.015625, %v556_v21  ;;  %vm581_vm1 = vweird.f32 %v573_v20 }
  0xdd   : > { %v564_v23 = vpop.xlane.xlu1 %563 }
  0xde   : > { %v568_v24 = vmul.f32 %v558_v22, %v558_v22  ;;  %v566_v25 = vmul.f32 0.015625, %v564_v23  ;;  %v572_v44 = vsub.f32 %v2668_v2, %v558_v22 }
  0xe0   : > { %v570_v26 = vsub.f32 %v566_v25, %v568_v24  ;;  %v2688_v25 = vld [vmem:[%s478_s12] ss:$0 sm:$0xff] }
  0xe2   : > { %v2070_v27 = vpop.eup %2069  ;;  %v574_v28 = vadd.f32 1e-05, %v570_v26 }
  0xe3   : > { %v576_v29 = vmul.f32 %v2070_v27, %v573_v20  ;;  %vm582_vm0 = vweird.f32 %v2070_v27 }
  0xe4   : > { %2071 = vrsqrt.f32 %v574_v28  ;;  %vm583_vm2 = vmor %vm581_vm1, %vm582_vm0  ;;  %vm591_vm4 = vweird.f32 %v574_v28 }
  0xe5   : > { %v577_v30 = vmul.f32 %v2070_v27, %v576_v29 }
  0xe7   : > { %v578_v31 = vmul.f32 0.5, %v577_v30 }
  0xe9   : > { %v579_v32 = vsub.f32 1.5, %v578_v31 }
  0xea   : > { %v2072_v33 = vpop.eup %2071 }
  0xeb   : > { %v580_v34 = vmul.f32 %v2070_v27, %v579_v32  ;;  %v586_v35 = vmul.f32 %v2072_v33, %v574_v28  ;;  %vm592_vm3 = vweird.f32 %v2072_v33 }
  0xec   : > { %vm593_vm5 = vmor %vm591_vm4, %vm592_vm3 }
  0xed   : > { %v587_v36 = vmul.f32 %v2072_v33, %v586_v35  ;;  %v584_v37 = vsel %vm583_vm2, %v2070_v27, %v580_v34 }
  0xee   : > { %v595_v41 = vmul.f32 %v584_v37, %v571_v39 }
  0xef   : > { %v588_v38 = vmul.f32 0.5, %v587_v36 }
  0xf0   : > { %v601_v47 = vmul.f32 %v2063_v42, %v595_v41 }
  0xf1   : > { %v589_v40 = vsub.f32 1.5, %v588_v38 }
  0xf2   : > { %v607_v50 = vadd.f32 %v2064_v48, %v601_v47 }
  0xf3   : > { %v590_v43 = vmul.f32 %v2072_v33, %v589_v40 }
  0xf5   : > { %v594_v45 = vsel %vm593_vm5, %v2072_v33, %v590_v43 }
  0xf6   : > { %v596_v46 = vmul.f32 %v594_v45, %v572_v44 }
  0xf8   : > { %v602_v49 = vmul.f32 %v2063_v42, %v596_v46 }
  0xfa   : > { %v608_v51 = vadd.f32 %v2064_v48, %v602_v49 }
  0xfc   : > { %v609_v52 = vpack.c.bf16 %v608_v51, %v607_v50 }
  0xfe   : > { %786 = vmatmul.bf16.vlgmr.msra.gmra.mxu0 %v609_v52  ;;  %800 = vmatmul.bf16.vlgmr.msra.gmra.mxu1 %v609_v52 }
  0xff   : > { %814 = vmatmul.bf16.vlgmr.msra.gmra.mxu2 %v609_v52 }
 0x17b   : > { %v787_v54 = vpop.f32.mrf.mxu0  ;;  %v801_v55 = vpop.f32.mrf.mxu1 }
 0x17c   : > { %v802_v58 = vadd.f32 %v801_v55, %v645_v56  ;;  %v788_v63 = vadd.f32 %v787_v54, %v644_v57 }
 0x17e   : > { %v824_v1 = vpack.c.bf16 %v802_v58, %v802_v58  ;;  %v820_v8 = vmul.f32 0.25, %v788_v63 }
 0x180   : > { %v840_v9 = vunpack.c.l.b16 %v824_v1  ;;  %v822_v16 = vpack.c.bf16 %v820_v8, %v820_v8 }
 0x182   : > { %v815_v59 = vpop.f32.mrf.mxu2  ;;  %v835_v22 = vunpack.c.l.b16 %v822_v16 }
 0x183   : > { %v789_v61 = vpop.f32.mrf.mxu0  ;;  %v803_v62 = vpop.f32.mrf.mxu1  ;;  %v816_v7 = vadd.f32 %v815_v59, %v646_v60 }
 0x184   : > { %v790_v3 = vadd.f32 %v789_v61, %v644_v57  ;;  %v804_v4 = vadd.f32 %v803_v62, %v645_v56  ;;  %v2417_v57 = vmov 0.0  }
 0x185   : > { %v826_v14 = vpack.c.bf16 %v816_v7, %v816_v7  ;;  %828 = vst [vmem:[#allocation2] sm:$0xff] %v2417_v57 }
 0x186   : > { %v821_v5 = vmul.f32 0.25, %v790_v3  ;;  %v825_v6 = vpack.c.bf16 %v804_v4, %v804_v4  ;;  %829 = vst [vmem:[#allocation2 + $0x8] sm:$0xff] %v2417_v57 }
 0x187   : > { %v895_v20 = vunpack.c.l.b16 %v826_v14 }
 0x188   : > { %v841_v10 = vunpack.c.l.b16 %v825_v6  ;;  %v823_v11 = vpack.c.bf16 %v821_v5, %v821_v5 }
 0x18a   : > { %v842_v12 = vpack.c.b16 %v841_v10, %v840_v9  ;;  %v817_v13 = vpop.f32.mrf.mxu2  ;;  %v836_v19 = vunpack.c.l.b16 %v823_v11 }
 0x18b   : > { %v818_v15 = vadd.f32 %v817_v13, %v646_v60 }
 0x18c   : > { %v848_v17 = vsel %vm843_vm6, %v842_v12, 0  ;;  %v837_v24 = vpack.c.b16 %v836_v19, %v835_v22 }
 0x18d   : > { %v827_v18 = vpack.c.bf16 %v818_v15, %v818_v15  ;;  %857 = vmatpush.bf16.xpose.msrb.mxu0 %v848_v17 }
 0x18f   : > { %v896_v21 = vunpack.c.l.b16 %v827_v18 }
 0x191   : > { %v2682_v23 = vpack.c.b16 %v896_v21, %v895_v20 }
 0x193   : > { %909 = vmatpush.bf16.msra.mxu3 %v2682_v23 }
 0x194   : > { %1785 = vmatmul.msk.bf16.vlgmr.msrb.gmra.mxu0 %vm843_vm6, %v837_v24 }
 0x211   : > { %v859_v26 = vpop.f32.mrf.mxu0 }
 0x212   : > { %v860_v27 = vadd.f32 %v2688_v25, %v859_v26 }
 0x214   : > { %v864_v28 = vsel %vm843_vm6, %v860_v27, -inf }
 0x215   : > { %865 = vmax.xlane.f32.xlu2 %v864_v28 }
 0x219   : > { %v861_v29 = vpop.f32.mrf.mxu0 }
 0x21a   : > { %v862_v30 = vadd.f32 %v2688_v25, %v861_v29 }
 0x21c   : > { %v867_v31 = vsel %vm843_vm6, %v862_v30, -inf }
 0x21d   : > { %868 = vmax.xlane.f32.xlu2 %v867_v31 }
 0x235   : > { %920 = vrot.lane.b32.xlu2 %v842_v12, %s2414_s4 }
 0x23d   : > { %1088 = vrot.lane.b32.xlu2 %v842_v12, %s2415_s23 }
 0x245   : > { %1086 = vrot.lane.b32.xlu2 %v837_v24, %s2415_s23 }
 0x288   : > { %v866_v32 = vpop.xlane.xlu2 %865 }
 0x289   : > { %v870_v33 = vsub.f32 %v860_v27, %v866_v32 }
 0x28b   : > { %v872_v34 = vmul.f32 1.442695, %v870_v33 }
 0x28d   : > { %2073 = vpow2.f32 %v872_v34 }
 0x290   : > { %v869_v35 = vpop.xlane.xlu2 %868 }
 0x291   : > { %v871_v36 = vsub.f32 %v862_v30, %v869_v35 }
 0x293   : > { %v2074_v37 = vpop.eup %2073  ;;  %v874_v38 = vmul.f32 1.442695, %v871_v36 }
 0x294   : > { %v876_v39 = vsel %vm843_vm6, %v2074_v37, 0.0 }
 0x295   : > { %2075 = vpow2.f32 %v874_v38  ;;  %877 = vadd.xlane.f32.xlu0 %v876_v39 }
 0x298   : > { %v921_v40 = vpop.permute.xlu2 %920 }
 0x299   : > { %v926_v41 = vsel %vm843_vm6, %v921_v40, 0 }
 0x29a   : > { %935 = vmatpush.bf16.xpose.msrb.mxu3 %v926_v41 }
 0x29b   : > { %v2076_v42 = vpop.eup %2075 }
 0x29c   : > { %v879_v43 = vsel %vm843_vm6, %v2076_v42, 0.0 }
 0x29d   : > { %880 = vadd.xlane.f32.xlu1 %v879_v43 }
 0x2a0   : > { %v1089_v54 = vpop.permute.xlu2 %1088 }
 0x2a1   : > { %v1094_v56 = vsel %vm843_vm6, %v1089_v54, 0 }
 0x2a8   : > { %v1087_v62 = vpop.permute.xlu2 %1086 }
 0x2a9   : > { %918 = vrot.lane.b32.xlu0 %v837_v24, %s2414_s4 }
 0x2b1   : > { %1002 = vrot.lane.b32.xlu0 %v837_v24, %s2416_s18 }
 0x2b6   : > { %1004 = vrot.lane.b32.xlu1 %v842_v12, %s2416_s18 }
 0x308   : > { %v878_v44 = vpop.xlane.xlu0 %877 }
 0x309   : > { %2077 = vrcp.f32 %v878_v44 }
 0x30f   : > { %v2078_v46 = vpop.eup %2077 }
 0x310   : > { %v881_v45 = vpop.xlane.xlu1 %880  ;;  %v884_v47 = vmul.f32 %v2078_v46, %v2074_v37 }
 0x311   : > { %2079 = vrcp.f32 %v881_v45 }
 0x312   : > { %v886_v50 = vpack.c.bf16 %v884_v47, %v884_v47 }
 0x314   : > { %v890_v52 = vunpack.c.l.b16 %v886_v50 }
 0x317   : > { %v2080_v48 = vpop.eup %2079 }
 0x318   : > { %v885_v49 = vmul.f32 %v2080_v48, %v2076_v42 }
 0x31a   : > { %v887_v51 = vpack.c.bf16 %v885_v49, %v885_v49 }
 0x31b   : > { %v919_v58 = vpop.permute.xlu0 %918 }
 0x31c   : > { %v891_v53 = vunpack.c.l.b16 %v887_v51 }
 0x31e   : > { %v892_v55 = vpack.c.b16 %v891_v53, %v890_v52 }
 0x320   : > { %1786 = vmatmul.msk.bf16.vlgmr.msra.gmra.mxu3 %vm843_vm6, %v892_v55 }
 0x321   : > { %1103 = vmatpush.bf16.xpose.msra.mxu3 %v1094_v56 }
 0x323   : > { %v1003_v61 = vpop.permute.xlu0 %1002 }
 0x328   : > { %v1005_v59 = vpop.permute.xlu1 %1004 }
 0x329   : > { %v1010_v60 = vsel %vm843_vm6, %v1005_v59, 0 }
 0x32a   : > { %1019 = vmatpush.bf16.xpose.msrb.mxu1 %v1010_v60 }
 0x330   : > { %1787 = vmatmul.msk.bf16.vlgmr.msrb.gmra.mxu3 %vm843_vm6, %v919_v58 }
 0x331   : > { %1789 = vmatmul.msk.bf16.vlgmr.msrb.gmra.mxu1 %vm843_vm6, %v1003_v61 }
 0x340   : > { %1791 = vmatmul.msk.bf16.vlgmr.msra.gmra.mxu3 %vm843_vm6, %v1087_v62 }
 0x3a3   : > { %v911_v63 = vpop.f32.mrf.mxu3 }
 0x3a4   : > { %916 = vst.msk [vmem:[#allocation2] sm:$0xff] %vm843_vm6, %v911_v63 }
 0x3ab   : > { %v913_v1 = vpop.f32.mrf.mxu3 }
 0x3ac   : > { %917 = vst.msk [vmem:[#allocation2 + $0x8] sm:$0xff] %vm843_vm6, %v913_v1 }
 0x3ae   : > { %v1021_v3 = vpop.f32.mrf.mxu1 }
 0x3af   : > { %v1022_v4 = vadd.f32 %v2688_v25, %v1021_v3 }
 0x3b1   : > { %v1026_v5 = vsel %vm843_vm6, %v1022_v4, -inf }
 0x3b2   : > { %1027 = vmax.xlane.f32.xlu2 %v1026_v5 }
 0x3b3   : > { %v937_v6 = vpop.f32.mrf.mxu3 }
 0x3b4   : > { %v938_v7 = vadd.f32 %v2688_v25, %v937_v6 }
 0x3b6   : > { %v942_v8 = vsel %vm843_vm6, %v938_v7, -inf  ;;  %v1023_v9 = vpop.f32.mrf.mxu1 }
 0x3b7   : > { %943 = vmax.xlane.f32.xlu1 %v942_v8  ;;  %v1024_v10 = vadd.f32 %v2688_v25, %v1023_v9 }
 0x3b9   : > { %v1029_v14 = vsel %vm843_vm6, %v1024_v10, -inf }
 0x3bb   : > { %v939_v11 = vpop.f32.mrf.mxu3 }
 0x3bc   : > { %v940_v12 = vadd.f32 %v2688_v25, %v939_v11 }
 0x3be   : > { %v945_v13 = vsel %vm843_vm6, %v940_v12, -inf }
 0x3bf   : > { %946 = vmax.xlane.f32.xlu0 %v945_v13  ;;  %1030 = vmax.xlane.f32.xlu1 %v1029_v14 }
 0x3c3   : > { %v1105_v15 = vpop.f32.mrf.mxu3 }
 0x3c4   : > { %v1106_v16 = vadd.f32 %v2688_v25, %v1105_v15 }
 0x3c6   : > { %v1110_v17 = vsel %vm843_vm6, %v1106_v16, -inf }
 0x3c7   : > { %1111 = vmax.xlane.f32.xlu0 %v1110_v17 }
 0x3cb   : > { %v1107_v18 = vpop.f32.mrf.mxu3 }
 0x3cc   : > { %v1108_v19 = vadd.f32 %v2688_v25, %v1107_v18 }
 0x3ce   : > { %v1113_v20 = vsel %vm843_vm6, %v1108_v19, -inf }
 0x3cf   : > { %1114 = vmax.xlane.f32.xlu2 %v1113_v20 }
 0x425   : > { %v1028_v21 = vpop.xlane.xlu2 %1027 }
 0x426   : > { %v1032_v22 = vsub.f32 %v1022_v4, %v1028_v21 }
 0x428   : > { %v1034_v24 = vmul.f32 1.442695, %v1032_v22 }
 0x42a   : > { %2081 = vpow2.f32 %v1034_v24  ;;  %v944_v26 = vpop.xlane.xlu1 %943 }
 0x42b   : > { %v948_v35 = vsub.f32 %v938_v7, %v944_v26 }
 0x42d   : > { %v950_v25 = vmul.f32 1.442695, %v948_v35  ;;  %v1926_v35 = vld [vmem:[#allocation11 + $0x28] sm:$0xff] }
 0x430   : > { %v2082_v27 = vpop.eup %2081 }
 0x431   : > { %v1038_v28 = vsel %vm843_vm6, %v2082_v27, 0.0 }
 0x432   : > { %v947_v29 = vpop.xlane.xlu0 %946  ;;  %v1031_v30 = vpop.xlane.xlu1 %1030  ;;  %1039 = vadd.xlane.f32.xlu2 %v1038_v28 }
 0x433   : > { %v949_v31 = vsub.f32 %v940_v12, %v947_v29  ;;  %v1033_v32 = vsub.f32 %v1024_v10, %v1031_v30 }
 0x435   : > { %v952_v33 = vmul.f32 1.442695, %v949_v31  ;;  %v1036_v34 = vmul.f32 1.442695, %v1033_v32 }
 0x437   : > { %2083 = vpow2.f32 %v952_v33  ;;  %v1928_v33 = vld [vmem:[#allocation11 + $0x38] sm:$0xff] }
 0x438   : > { %2085 = vpow2.f32 %v1036_v34  ;;  %1241 = vmatpush.bf16.msra.mxu1 %v1928_v33  ;;  %v1927_v34 = vld [vmem:[#allocation11 + $0x30] sm:$0xff] }
 0x439   : > { %2087 = vpow2.f32 %v950_v25  ;;  %v1925_v25 = vld [vmem:[#allocation11 + $0x20] sm:$0xff]  ;;  %v1939_v33 = vld [vmem:[#allocation14 + $0x10] sm:$0xff] }
 0x43a   : > { %v1112_v36 = vpop.xlane.xlu0 %1111 }
 0x43b   : > { %v1116_v37 = vsub.f32 %v1106_v16, %v1112_v36  ;;  %v1924_v36 = vld [vmem:[#allocation11 + $0x18] sm:$0xff] }
 0x43c   : > { %1242 = vmatpush.bf16.msra.mxu1 %v1927_v34 }
 0x43d   : > { %v2084_v38 = vpop.eup %2083  ;;  %v1118_v39 = vmul.f32 1.442695, %v1116_v37  ;;  %v1923_v37 = vld [vmem:[#allocation11 + $0x10] sm:$0xff] }
 0x43e   : > { %v2086_v40 = vpop.eup %2085  ;;  %v957_v41 = vsel %vm843_vm6, %v2084_v38, 0.0 }
 0x43f   : > { %2089 = vpow2.f32 %v1118_v39  ;;  %v1041_v42 = vsel %vm843_vm6, %v2086_v40, 0.0  ;;  %958 = vadd.xlane.f32.xlu0 %v957_v41  ;;  %v2088_v45 = vpop.eup %2087  ;;  %v1921_v39 = vld [vmem:[#allocation11] sm:$0xff] }
 0x440   : > { %1042 = vadd.xlane.f32.xlu1 %v1041_v42  ;;  %v954_v49 = vsel %vm843_vm6, %v2088_v45, 0.0  ;;  %1243 = vmatpush.bf16.msra.mxu1 %v1926_v35 }
 0x442   : > { %v1115_v43 = vpop.xlane.xlu2 %1114 }
 0x443   : > { %v1117_v44 = vsub.f32 %v1108_v19, %v1115_v43  ;;  %v1935_v43 = vld [vmem:[#allocation12 + $0x30] sm:$0xff] }
 0x444   : > { %1244 = vmatpush.bf16.msra.mxu1 %v1925_v25 }
 0x445   : > { %v2090_v46 = vpop.eup %2089  ;;  %v1120_v47 = vmul.f32 1.442695, %v1117_v44  ;;  %v1934_v44 = vld [vmem:[#allocation12 + $0x28] sm:$0xff] }
 0x446   : > { %v1122_v48 = vsel %vm843_vm6, %v2090_v46, 0.0 }
 0x447   : > { %2091 = vpow2.f32 %v1120_v47  ;;  %1123 = vadd.xlane.f32.xlu2 %v1122_v48 }
 0x448   : > { %955 = vadd.xlane.f32.xlu1 %v954_v49  ;;  %1245 = vmatpush.bf16.msra.mxu1 %v1924_v36 }
 0x44c   : > { %1246 = vmatpush.bf16.msra.mxu1 %v1923_v37 }
 0x44d   : > { %v2092_v50 = vpop.eup %2091 }
 0x44e   : > { %v1125_v51 = vsel %vm843_vm6, %v2092_v50, 0.0 }
 0x450   : > { %1126 = vadd.xlane.f32.xlu1 %v1125_v51 }
 0x453   : > { %971 = vrot.lane.b32.xlu0 %v2682_v23, %s2414_s4  ;;  %s1528_s4 = sshll.u32 %s548_s16, 4  ;;  %s1529_s4 = int_to_ptr.vmem [resolvable:$true] %s1528_s4 }
 0x45f   : > { %1055 = vrot.lane.b32.xlu2 %v2682_v23, %s2416_s18 }
 0x469   : > { %1139 = vrot.lane.b32.xlu1 %v2682_v23, %s2415_s23  ;;  %s1530_s23 = sshll.u32 %s1527_s20, 4  ;;  %s1531_s23 = int_to_ptr.hbm [resolvable:$true] %s1530_s23 }
 0x46a   : > { %s2333_s18 = sshra.s32 %s1531_s23, 4  ;;  %s2334_s18 = int_to_ptr.hbm [resolvable:$true] %s2333_s18 }
 0x46b   : > { %p2340_p7 = scmp.lt.s32.totalorder %s2334_s18, %s2854_s15 }
 0x4a5   : > { %v1040_v52 = vpop.xlane.xlu2 %1039 }
 0x4a6   : > { %2093 = vrcp.f32 %v1040_v52 }
 0x4ac   : > { %v2094_v55 = vpop.eup %2093 }
 0x4ad   : > { %v1046_v57 = vmul.f32 %v2094_v55, %v2082_v27  ;;  %v1930_v55 = vld [vmem:[#allocation12 + $0x8] sm:$0xff] }
 0x4af   : > { %v1048_v63 = vpack.c.bf16 %v1046_v57, %v1046_v57 }
 0x4b1   : > { %v1052_v23 = vunpack.c.l.b16 %v1048_v63 }
 0x4b2   : > { %v959_v54 = vpop.xlane.xlu0 %958 }
 0x4b3   : > { %v1043_v53 = vpop.xlane.xlu1 %1042 }
 0x4b4   : > { %2095 = vrcp.f32 %v1043_v53  ;;  %v1932_v53 = vld [vmem:[#allocation12 + $0x18] sm:$0xff] }
 0x4b5   : > { %2097 = vrcp.f32 %v959_v54  ;;  %v1931_v54 = vld [vmem:[#allocation12 + $0x10] sm:$0xff] }
 0x4ba   : > { %v2096_v56 = vpop.eup %2095  ;;  %v1124_v58 = vpop.xlane.xlu2 %1123 }
 0x4bb   : > { %v1047_v59 = vmul.f32 %v2096_v56, %v2086_v40  ;;  %v956_v60 = vpop.xlane.xlu1 %955  ;;  %v2098_v61 = vpop.eup %2097  ;;  %v1936_v40 = vld [vmem:[#allocation12 + $0x38] sm:$0xff]  ;;  %v1929_v56 = vld [vmem:[#allocation12] sm:$0xff] }
 0x4bc   : > { %2099 = vrcp.f32 %v956_v60  ;;  %v963_v1 = vmul.f32 %v2098_v61, %v2084_v38  ;;  %v1922_v38 = vld [vmem:[#allocation11 + $0x8] sm:$0xff] }
 0x4bd   : > { %v1049_v62 = vpack.c.bf16 %v1047_v59, %v1047_v59  ;;  %1247 = vmatpush.bf16.msra.mxu1 %v1922_v38 }
 0x4be   : > { %v965_v6 = vpack.c.bf16 %v963_v1, %v963_v1 }
 0x4bf   : > { %v1053_v3 = vunpack.c.l.b16 %v1049_v62 }
 0x4c0   : > { %v969_v12 = vunpack.c.l.b16 %v965_v6 }
 0x4c1   : > { %v1054_v8 = vpack.c.b16 %v1053_v3, %v1052_v23  ;;  %1248 = vmatpush.bf16.msra.mxu1 %v1921_v39  ;;  %v2067_v3 = vld [vmem:[%s2821_s9] ss:$0 sm:$0xff] }
 0x4c2   : > { %v2100_v4 = vpop.eup %2099  ;;  %v1056_v5 = vpop.permute.xlu2 %1055 }
 0x4c3   : > { %v962_v7 = vmul.f32 %v2100_v4, %v2088_v45  ;;  %1068 = vmatpush.bf16.msrb.mxu2 %v1056_v5  ;;  %v1127_v10 = vpop.xlane.xlu1 %1126  ;;  %v1944_v5 = vld [vmem:[#allocation14 + $0x38] sm:$0xff] }
 0x4c4   : > { %2101 = vrcp.f32 %v1127_v10  ;;  %1497 = vmatpush.bf16.msrb.mxu3 %v1944_v5 }
 0x4c5   : > { %v964_v9 = vpack.c.bf16 %v962_v7, %v962_v7  ;;  %v972_v11 = vpop.permute.xlu0 %971  ;;  %2103 = vrcp.f32 %v1124_v58  ;;  %v2066_v58 = vld [vmem:[%s2819_s7] ss:$0 sm:$0xff] }
 0x4c6   : > { %984 = vmatpush.bf16.msra.mxu0 %v972_v11  ;;  %1790 = vmatmul.msk.bf16.vlgmr.msrb.gmra.mxu2 %vm843_vm6, %v1054_v8 }
 0x4c7   : > { %v968_v13 = vunpack.c.l.b16 %v964_v9  ;;  %1326 = vmatpush.bf16.msra.mxu2 %v1936_v40  ;;  %v1938_v40 = vld [vmem:[#allocation14 + $0x8] sm:$0xff] }
 0x4c9   : > { %v970_v14 = vpack.c.b16 %v969_v12, %v968_v13  ;;  %v1942_v12 = vld [vmem:[#allocation14 + $0x28] sm:$0xff] }
 0x4ca   : > { %v2102_v15 = vpop.eup %2101 }
 0x4cb   : > { %1788 = vmatmul.msk.bf16.vlgmr.msra.gmra.mxu0 %vm843_vm6, %v970_v14  ;;  %v2104_v16 = vpop.eup %2103  ;;  %v1131_v17 = vmul.f32 %v2102_v15, %v2092_v50  ;;  %1327 = vmatpush.bf16.msra.mxu2 %v1935_v43 }
 0x4cc   : > { %v1130_v18 = vmul.f32 %v2104_v16, %v2090_v46  ;;  %v1933_v46 = vld [vmem:[#allocation12 + $0x20] sm:$0xff] }
 0x4cd   : > { %v1133_v19 = vpack.c.bf16 %v1131_v17, %v1131_v17  ;;  %v1941_v17 = vld [vmem:[#allocation14 + $0x20] sm:$0xff] }
 0x4ce   : > { %v1132_v20 = vpack.c.bf16 %v1130_v18, %v1130_v18 }
 0x4cf   : > { %v1137_v21 = vunpack.c.l.b16 %v1133_v19  ;;  %1328 = vmatpush.bf16.msra.mxu2 %v1934_v44 }
 0x4d0   : > { %v1136_v22 = vunpack.c.l.b16 %v1132_v20 }
 0x4d2   : > { %v1138_v26 = vpack.c.b16 %v1137_v21, %v1136_v22 }
 0x4d3   : > { %1329 = vmatpush.bf16.msra.mxu2 %v1933_v46  ;;  %v1937_v46 = vld [vmem:[#allocation14] sm:$0xff] }
 0x4d7   : > { %1330 = vmatpush.bf16.msra.mxu2 %v1932_v53 }
 0x4db   : > { %v1140_v24 = vpop.permute.xlu1 %1139  ;;  %1331 = vmatpush.bf16.msra.mxu2 %v1931_v54 }
 0x4dc   : > { %1152 = vmatpush.bf16.msrb.mxu0 %v1140_v24  ;;  %v1940_v24 = vld [vmem:[#allocation14 + $0x18] sm:$0xff] }
 0x4df   : > { %1792 = vmatmul.msk.bf16.vlgmr.msrb.gmra.mxu0 %vm843_vm6, %v1138_v26  ;;  %1332 = vmatpush.bf16.msra.mxu2 %v1930_v55 }
 0x4e3   : > { %1333 = vmatpush.bf16.msra.mxu2 %v1929_v56 }
 0x548   : > { %v986_v27 = vpop.f32.mrf.mxu0 }
 0x549   : > { %993 = vrot.lane.b32.xlu0 %v986_v27, %s2418_s25  ;;  %v1070_v28 = vpop.f32.mrf.mxu2 }
 0x54a   : > { %1077 = vrot.lane.b32.xlu2 %v1070_v28, %s2419_s3 }
 0x550   : > { %v988_v29 = vpop.f32.mrf.mxu0 }
 0x551   : > { %995 = vrot.lane.b32.xlu0 %v988_v29, %s2418_s25  ;;  %v1072_v30 = vpop.f32.mrf.mxu2  ;;  %s2335_s25 = scalar_lea.hbm %s2334_s18, 16 }
 0x552   : > { %p2336_p1 = scmp.ne.s32.totalorder %s2334_s18, %s2335_s25 }
 0x554   : > { %p2337_p3 = pnand %p2336_p1, %p2578_p0 }
 0x556   : > { %p2338_p13 = pneg %p2337_p3 }
 0x559   : > { %1079 = vrot.lane.b32.xlu0 %v1072_v30, %s2419_s3 }
 0x55c   : > { %v1154_v31 = vpop.f32.mrf.mxu0 }
 0x55d   : > { %1161 = vrot.lane.b32.xlu1 %v1154_v31, %s2420_s6 }
 0x564   : > { %v1156_v32 = vpop.f32.mrf.mxu0 }
 0x565   : > { %1163 = vrot.lane.b32.xlu2 %v1156_v32, %s2420_s6  ;;  %s2339_s6 = scalar_lea.hbm %s2854_s15, 32 }
 0x566   : > { %p2341_p9 = scmp.lt.s32.totalorder %s2339_s6, %s2335_s25 }
 0x568   : > { %p2342_p4 = por %p2341_p9, %p2340_p7 }
 0x56a   : > { %p2343_p8 = pnand %p2342_p4, %p2338_p13 }
 0x5a4   : > { %v1078_v42 = vpop.permute.xlu2 %1077 }
 0x5bb   : > { %v994_v41 = vpop.permute.xlu0 %993 }
 0x5bc   : > { %1000 = vst.msk [vmem:[#allocation2] sm:$0xff] %vm999_vm7, %v994_v41 }
 0x5bd   : > { %1084 = vst.msk [vmem:[#allocation2] sm:$0xff] %vm1083_vm8, %v1078_v42 }
 0x5bf   : > { %v1164_v48 = vpop.permute.xlu2 %1163 }
 0x5c3   : > { %v996_v45 = vpop.permute.xlu0 %995 }
 0x5c4   : > { %1001 = vst.msk [vmem:[#allocation2 + $0x8] sm:$0xff] %vm999_vm7, %v996_v45 }
 0x5cb   : > { %v1080_v47 = vpop.permute.xlu0 %1079 }
 0x5cc   : > { %1085 = vst.msk [vmem:[#allocation2 + $0x8] sm:$0xff] %vm1083_vm8, %v1080_v47 }
 0x5cd   : > { %1169 = vst.msk [vmem:[#allocation2 + $0x8] sm:$0xff] %vm1167_vm9, %v1164_v48 }
 0x5cf   : > { %v1162_v49 = vpop.permute.xlu1 %1161 }
 0x5d0   : > { %1168 = vst.msk [vmem:[#allocation2] sm:$0xff] %vm1167_vm9, %v1162_v49 }
 0x5d4   : > { %v1171_v51 = vld [vmem:[#allocation2 + $0x8] sm:$0xff] }
 0x5d7   : > { %v1170_v50 = vld [vmem:[#allocation2] sm:$0xff] }
 0x5d8   : > { %v1172_v52 = vpack.c.bf16 %v1171_v51, %v1170_v50 }
 0x5da   : > { %1249 = vmatmul.bf16.vlgmr.msra.gmra.mxu1 %v1172_v52 }
 0x657   : > { %v1250_v57 = vpop.f32.mrf.mxu1 }
 0x658   : > { %v1251_v59 = vadd.f32 %v2066_v58, %v1250_v57 }
 0x65a   : > { %v2744_v62 = vadd.f32 %v1251_v59, %v2663_v0 }
 0x65f   : > { %v1252_v60 = vpop.f32.mrf.mxu1 }
 0x660   : > { %v1253_v61 = vadd.f32 %v2066_v58, %v1252_v60 }
 0x662   : > { %v2747_v63 = vadd.f32 %v1253_v61, %v2668_v2  ;;  %v1943_v2 = vld [vmem:[#allocation14 + $0x30] sm:$0xff] }
 0x663   : > { %1498 = vmatpush.bf16.msrb.mxu3 %v1943_v2 }
 0x664   : > { %v1257_v1 = vpack.c.bf16 %v2747_v63, %v2744_v62 }
 0x666   : > { %1334 = vmatmul.bf16.vlgmr.msra.gmra.mxu2 %v1257_v1 }
 0x667   : > { %1499 = vmatpush.bf16.msrb.mxu3 %v1942_v12 }
 0x66b   : > { %1500 = vmatpush.bf16.msrb.mxu3 %v1941_v17 }
 0x66f   : > { %1501 = vmatpush.bf16.msrb.mxu3 %v1940_v24 }
 0x673   : > { %1502 = vmatpush.bf16.msrb.mxu3 %v1939_v33 }
 0x677   : > { %1503 = vmatpush.bf16.msrb.mxu3 %v1938_v40 }
 0x67b   : > { %1504 = vmatpush.bf16.msrb.mxu3 %v1937_v46 }
 0x6e9   : > { %v1335_v4 = vpop.f32.mrf.mxu2 }
 0x6ea   : > { %v2754_v23 = vadd.f32 %v2067_v3, %v1335_v4 }
 0x6ec   : > { %v2757_v6 = vmul.f32 0.70710677, %v2754_v23 }
 0x6ee   : > { %v1344_v0 = vmul.f32 %v2757_v6, %v2757_v6 }
 0x6f0   : > { %v1345_v7 = vmin.f32 %v1344_v0, 16.0 }
 0x6f1   : > { %v1337_v8 = vpop.f32.mrf.mxu2 }
 0x6f2   : > { %v1346_v9 = vmul.f32 2.1237322e-06, %v1345_v7  ;;  %v1357_v10 = vmul.f32 3.8918573e-05, %v1345_v7  ;;  %v2761_v11 = vadd.f32 %v2067_v3, %v1337_v8 }
 0x6f4   : > { %v1347_v13 = vadd.f32 0.00028619796, %v1346_v9  ;;  %v1358_v14 = vadd.f32 0.001143296, %v1357_v10  ;;  %v2764_v15 = vmul.f32 0.70710677, %v2761_v11 }
 0x6f6   : > { %v1359_v16 = vmul.f32 %v1358_v14, %v1345_v7  ;;  %v1384_v18 = vmul.f32 %v2764_v15, %v2764_v15  ;;  %v1348_v19 = vmul.f32 %v1347_v13, %v1345_v7 }
 0x6f8   : > { %v1360_v20 = vadd.f32 0.014752088, %v1359_v16  ;;  %v1385_v21 = vmin.f32 %v1384_v18, 16.0  ;;  %v1349_v28 = vadd.f32 0.0036580483, %v1348_v19 }
 0x6fa   : > { %v1361_v22 = vmul.f32 %v1360_v20, %v1345_v7  ;;  %v1386_v26 = vmul.f32 2.1237322e-06, %v1385_v21  ;;  %v1397_v27 = vmul.f32 3.8918573e-05, %v1385_v21  ;;  %v1350_v25 = vmul.f32 %v1349_v28, %v1345_v7 }
 0x6fc   : > { %v1362_v29 = vadd.f32 0.112945676, %v1361_v22  ;;  %v1387_v30 = vadd.f32 0.00028619796, %v1386_v26  ;;  %v1398_v31 = vadd.f32 0.001143296, %v1397_v27 }
 0x6fd   : > { %v1351_v42 = vadd.f32 0.05243302, %v1350_v25 }
 0x6fe   : > { %v1363_v32 = vmul.f32 %v1362_v29, %v1345_v7  ;;  %v1388_v34 = vmul.f32 %v1387_v30, %v1385_v21  ;;  %v1399_v35 = vmul.f32 %v1398_v31, %v1385_v21  ;;  %v1340_v29 = vmul.f32 0.5, %v2754_v23 }
 0x6ff   : > { %v1352_v48 = vmul.f32 %v1351_v42, %v1345_v7  ;;  %v1341_v30 = vmul.f32 0.5, %v2761_v11 }
 0x700   : > { %v1364_v36 = vadd.f32 0.4994258, %v1363_v32  ;;  %v1389_v37 = vadd.f32 0.0036580483, %v1388_v34  ;;  %v1400_v38 = vadd.f32 0.014752088, %v1399_v35 }
 0x701   : > { %v1353_v53 = vadd.f32 0.18741608, %v1352_v48 }
 0x702   : > { %v1365_v39 = vmul.f32 %v1364_v36, %v1345_v7  ;;  %v1401_v41 = vmul.f32 %v1400_v38, %v1385_v21  ;;  %v1390_v44 = vmul.f32 %v1389_v37, %v1385_v21 }
 0x703   : > { %v1354_v58 = vmul.f32 %v1353_v53, %v1345_v7 }
 0x704   : > { %v1366_v43 = vadd.f32 1.0, %v1365_v39  ;;  %v1402_v45 = vadd.f32 0.112945676, %v1401_v41  ;;  %v1391_v49 = vadd.f32 0.05243302, %v1390_v44 }
 0x705   : > { %v1355_v4 = vadd.f32 1.1283791, %v1354_v58 }
 0x706   : > { %2105 = vrcp.f32 %v1366_v43  ;;  %v1403_v47 = vmul.f32 %v1402_v45, %v1385_v21  ;;  %v1392_v55 = vmul.f32 %v1391_v49, %v1385_v21  ;;  %v1378_v60 = vand.u32 2147483648, %v1366_v43 }
 0x707   : > { %v1376_v1 = vand.u32 2147483647, %v1366_v43  ;;  %vm1372_vm11 = vweird.f32 %v1366_v43  ;;  %v1356_v12 = vmul.f32 %v1355_v4, %v2757_v6 }
 0x708   : > { %v1404_v50 = vadd.f32 0.4994258, %v1403_v47  ;;  %v1393_v61 = vadd.f32 0.18741608, %v1392_v55  ;;  %v1379_v2 = vor.u32 1.1754944e-38, %v1378_v60 }
 0x709   : > { %vm1377_vm13 = vcmp.eq.f32.partialorder %v1376_v1, 8.507059e+37 }
 0x70a   : > { %v1405_v51 = vmul.f32 %v1404_v50, %v1385_v21  ;;  %v1394_v8 = vmul.f32 %v1393_v61, %v1385_v21 }
 0x70c   : > { %v2106_v52 = vpop.eup %2105  ;;  %v1406_v56 = vadd.f32 1.0, %v1405_v51  ;;  %v1395_v7 = vadd.f32 1.1283791, %v1394_v8 }
 0x70d   : > { %v1368_v54 = vmul.f32 %v2106_v52, %v1366_v43  ;;  %vm1373_vm10 = vweird.f32 %v2106_v52 }
 0x70e   : > { %2107 = vrcp.f32 %v1406_v56  ;;  %vm1374_vm12 = vmor %vm1372_vm11, %vm1373_vm10  ;;  %v1418_v14 = vand.u32 2147483648, %v1406_v56  ;;  %v1416_v18 = vand.u32 2147483647, %v1406_v56  ;;  %vm1412_vm15 = vweird.f32 %v1406_v56 }
 0x70f   : > { %v1369_v57 = vsub.f32 1.0, %v1368_v54  ;;  %v1396_v24 = vmul.f32 %v1395_v7, %v2764_v15  ;;  %v2068_v15 = vld [vmem:[%s2823_s11] ss:$0 sm:$0xff] }
 0x710   : > { %v1419_v20 = vor.u32 1.1754944e-38, %v1418_v14  ;;  %vm1417_vm1 = vcmp.eq.f32.partialorder %v1416_v18, 8.507059e+37 }
 0x711   : > { %v1370_v59 = vmul.f32 %v2106_v52, %v1369_v57 }
 0x713   : > { %v1371_v3 = vadd.f32 %v2106_v52, %v1370_v59 }
 0x714   : > { %v2108_v5 = vpop.eup %2107 }
 0x715   : > { %v1375_v0 = vsel %vm1374_vm12, %v2106_v52, %v1371_v3  ;;  %v1408_v9 = vmul.f32 %v2108_v5, %v1406_v56  ;;  %vm1413_vm14 = vweird.f32 %v2108_v5 }
 0x716   : > { %v1380_v10 = vsel %vm1377_vm13, %v1379_v2, %v1375_v0  ;;  %vm1414_vm0 = vmor %vm1412_vm15, %vm1413_vm14 }
 0x717   : > { %v1409_v13 = vsub.f32 1.0, %v1408_v9  ;;  %v1381_v16 = vmul.f32 %v1380_v10, %v1356_v12 }
 0x719   : > { %v1410_v17 = vmul.f32 %v2108_v5, %v1409_v13  ;;  %v1857_v22 = vclamps-f32 %v1381_v16, 1.0 }
 0x71b   : > { %v1411_v19 = vadd.f32 %v2108_v5, %v1410_v17  ;;  %v1424_v6 = vadd.f32 1.0, %v1857_v22 }
 0x71d   : > { %v1415_v21 = vsel %vm1414_vm0, %v2108_v5, %v1411_v19  ;;  %v1426_v32 = vmul.f32 %v1424_v6, %v1340_v29 }
 0x71e   : > { %v1420_v26 = vsel %vm1417_vm1, %v1419_v20, %v1415_v21 }
 0x71f   : > { %v1421_v27 = vmul.f32 %v1420_v26, %v1396_v24 }
 0x721   : > { %v1858_v28 = vclamps-f32 %v1421_v27, 1.0 }
 0x723   : > { %v1425_v31 = vadd.f32 1.0, %v1858_v28 }
 0x725   : > { %v1427_v33 = vmul.f32 %v1425_v31, %v1341_v30 }
 0x727   : > { %v1428_v34 = vpack.c.bf16 %v1427_v33, %v1426_v32 }
 0x729   : > { %1505 = vmatmul.bf16.vlgmr.msrb.gmra.mxu3 %v1428_v34 }
 0x7ac   : > { %v1506_v35 = vpop.f32.mrf.mxu3 }
 0x7ad   : > { %v1507_v25 = vadd.f32 %v2068_v15, %v1506_v35 }
 0x7af   : > { %v1511_v36 = vadd.f32 %v1507_v25, %v2744_v62 }
 0x7b1   : > { %1513 = vst [vmem:[%s548_s16] sm:$0xff] %v1511_v36 }
 0x7b4   : > { %v1508_v23 = vpop.f32.mrf.mxu3 }
 0x7b5   : > { %v1509_v11 = vadd.f32 %v2068_v15, %v1508_v23 }
 0x7b7   : > { %v1512_v37 = vadd.f32 %v1509_v11, %v2747_v63 }
 0x7b9   : > { %1514 = vst [vmem:[%s548_s16 + $0x8] sm:$0xff] %v1512_v37 }
 0x7ba   : > { %2346 = shalt.err (!%p2343_p8)
}
 0x7bb   : > { %s2421_s8 = smov 128   ;;  %s2422_s19 = smov 8  }
 0x7bc   : > { %1970 = dma.vmem_to_hbm [thread:$0]  (%p2578_p0), %s1529_s4, 256, %s1531_s23, %s1516_s28, %s2421_s8, %s2421_s8, %s2422_s19  }
 0x7bd PF: > { %s2855_s13 = sld [smem:[#allocation22_spill]]  ;;  %p2857_p10 = scmp.ge.s32.totalorder %s2401_s24, 2 }
 0x7bf   : > { %p1996_p11 = pnand %p2857_p10, %p2586_p6 }
 0x7c1   : > { %p1997_p12 = pneg %p1996_p11 }
 0x7c3   : > { %s1545_s29 = sand.u32 1, %s2855_s13  }
 0x7c4   : > { %s1546_s26 = scalar_lea.sflag [#allocation5], %s1545_s29 }
 0x7c5   : > { %2384 = dma.done.wait (%p1997_p12), %s1546_s26, 256  }
 0x7c6   : > { %2386 = vsyncadd (%p1997_p12), %s1546_s26, 4294967040  ;;  %s2858_s24 = sld [smem:[#allocation24_spill]]  ;;  %s2861_s21 = smov %s2393_s22 }
 0x7c7   : > { %s2859_s12 = sld [smem:[#allocation23_spill]] }
 0x7c8   : > { %s2860_s23 = sld [smem:[#allocation25_spill]] }
 0x7cc   : > { %p30_p2 = scmp.ge.s32.totalorder %s2858_s24, 4  }
 0x7cd   : > { %s2862_s22 = smov %s2859_s12 }
 0x7ce   :  { %32 = sbr.rel (!%p30_p2) target bundleno = 16 (0x10), region = 146 }
 0x7d3   :  { %1552 = vsyncpa [#allocation4], 1 }
 0x7d4   :  { %1554 = vsyncpa [#allocation4 + $0x1], 1 }
 0x7d5   :  { %1555 = vsyncpa [#allocation7], 1 }
 0x7d6   :  { %1557 = vsyncpa [#allocation7 + $0x1], 1 }
 0x7d7   :  { %1558 = vsyncpa [#allocation10], 1 }
 0x7d8   :  { %1559 = vsyncpa [#allocation13], 1 }
 0x7d9   :  { %1560 = vsyncpa [#allocation5], 1 }
 0x7da   :  { %1562 = vsyncpa [#allocation5 + $0x1], 1 }

</bundles_post_ra>
